<compile_context>
chip_gen: v7x
topology: tpu7x:2x2x1
jax: 0.10.0
libtpu: 0.0.40
codegen_flags: <defaults>
</compile_context>

<pallas_src>
import functools

import jax
import jax.numpy as jnp
from jax import lax
from jax.experimental import pallas as pl
from jax.experimental.pallas import tpu as pltpu


def _lstm_fc_kernel(x_ref,     # (T*BP, I)  f32  raw input, time-major, batch-padded
                    wih1_ref,  # (I, 4H)    f32  layer-1 input weights (packed gates)
                    b1_ref,    # (1, 4H)    f32  layer-1 bias (b_ih + b_hh)
                    whh1_ref,  # (H, 4H)    bf16 layer-1 recurrent weights
                    wih2_ref,  # (H, 4H)    bf16 layer-2 input weights
                    whh2_ref,  # (H, 4H)    bf16 layer-2 recurrent weights
                    b2_ref,    # (1, 4H)    f32  layer-2 bias (b_ih + b_hh)
                    wfc_ref,   # (H, OP)    bf16 final linear weights (cols 0-padded)
                    bfc_ref,   # (1, OP)    f32  final linear bias (0-padded)
                    out_ref,   # (BP, OP)   f32  forecast output (padded)
                    xp_ref,    # (T*BP, 4H) f32  scratch: x @ W_ih1 + b1, all steps
                    *, seq_len, batch_pad):
    T, BP = seq_len, batch_pad
    H, G = whh1_ref.shape                      # hidden size, 4*H packed gate width

    # Layer-1 input projection for every timestep: one f32 dot into VMEM scratch,
    # fully off the recurrent critical path (bias folded in here).
    xp_ref[...] = (
        jnp.dot(x_ref[...], wih1_ref[...], preferred_element_type=jnp.float32)
        + b1_ref[...])

    # Loop-invariant weight loads / bias broadcast, hoisted out of the recurrence.
    whh1 = whh1_ref[...]
    wih2 = wih2_ref[...]
    whh2 = whh2_ref[...]
    b2 = jnp.broadcast_to(b2_ref[...], (BP, G))

    def gates_to_hc(g, c):
        # g: (BP, 4H) pre-activations packed in PyTorch gate order [i | f | g | o].
        # Logistic evaluated once over the packed vreg (EUP tanh, no VALU divide);
        # per-gate extraction is cheap lane slicing, not 4 separate 128-lane blocks.
        sg = 0.5 * jnp.tanh(0.5 * g) + 0.5
        i_g = sg[:, 0 * H:1 * H]
        f_g = sg[:, 1 * H:2 * H]
        o_g = sg[:, 3 * H:4 * H]
        g_g = jnp.tanh(g[:, 2 * H:3 * H])
        c_new = f_g * c + i_g * g_g
        h_new = o_g * jnp.tanh(c_new)
        return h_new, c_new

    def step(t, carry):
        h1, c1, h2, c2, pre2 = carry
        row = pl.multiple_of(t * BP, BP)
        # Layer 1: precomputed input projection + recurrent dot (N = 4H = 128 lanes).
        g1 = xp_ref[pl.ds(row, BP), :] + jnp.dot(
            h1.astype(jnp.bfloat16), whh1, preferred_element_type=jnp.float32)
        h1, c1 = gates_to_hc(g1, c1)
        # Layer 2: pre2 = h2 @ W_hh2 + b2 was produced at the end of the previous
        # step, so only the h1-dependent dot is on this step's dependence chain.
        g2 = jnp.dot(h1.astype(jnp.bfloat16), wih2,
                     preferred_element_type=jnp.float32) + pre2
        h2, c2 = gates_to_hc(g2, c2)
        pre2 = jnp.dot(h2.astype(jnp.bfloat16), whh2,
                       preferred_element_type=jnp.float32) + b2
        return (h1, c1, h2, c2, pre2)

    zeros_h = jnp.zeros((BP, H), jnp.float32)
    init = (zeros_h, zeros_h, zeros_h, zeros_h, b2)   # pre2(t=0) = 0 @ W_hh2 + b2
    _, _, h2_final, _, _ = lax.fori_loop(0, T, step, init, unroll=True)

    # Final projection (dropout is identity in eval mode). Lane-dense (OP=128) store.
    out_ref[...] = (
        jnp.dot(h2_final.astype(jnp.bfloat16), wfc_ref[...],
                preferred_element_type=jnp.float32) + bfc_ref[...])


@functools.partial(jax.jit, static_argnames=("out_size",))
def lstm_heat_forecaster(x, kp, *, out_size):
    """x: (B, T, I) float32, batch_first (like the PyTorch module)."""
    B, T, I = x.shape
    H = kp["w_hh1"].shape[0]
    G = kp["b1"].shape[1]                     # 4 * H
    OP = kp["b_fc"].shape[1]
    BP = -(-B // 8) * 8                       # pad batch to a full f32 sublane group

    # Time-major, batch padded (padded rows are harmless and sliced off), flattened so
    # the kernel can do the whole layer-1 input projection in a single dot.
    x_tm = jnp.zeros((T, BP, I), jnp.float32).at[:, :B, :].set(jnp.swapaxes(x, 0, 1))
    x_flat = x_tm.reshape(T * BP, I)

    vmem = pl.BlockSpec(memory_space=pltpu.MemorySpace.VMEM)
    kernel = functools.partial(_lstm_fc_kernel, seq_len=T, batch_pad=BP)
    out_p = pl.pallas_call(
        kernel,
        out_shape=jax.ShapeDtypeStruct((BP, OP), jnp.float32),
        in_specs=[vmem] * 9,
        out_specs=vmem,
        scratch_shapes=[pltpu.VMEM((T * BP, G), jnp.float32)],
        compiler_params=pltpu.CompilerParams(vmem_limit_bytes=32 * 1024 * 1024),
    )(x_flat, kp["w_ih1"], kp["b1"], kp["w_hh1"], kp["w_ih2"], kp["w_hh2"],
      kp["b2"], kp["w_fc"], kp["b_fc"])

    return out_p[:B, :out_size]


def init_params(key, input_size, hidden_size, output_size, *, out_pad=128):
    """PyTorch-style init (uniform +-1/sqrt(H)); returns (kernel_params, ref_params).

    Kernel params keep the four gates packed into 4H contiguous columns (with H=32
    that is exactly one 128-lane group, so no per-gate lane padding is needed);
    MXU weight operands are stored in bf16; the FC output is padded to 128 lanes.
    """
    H, I, O = hidden_size, input_size, output_size
    OP = -(-O // out_pad) * out_pad
    stdv = 1.0 / jnp.sqrt(jnp.float32(H))
    ks = jax.random.split(key, 10)

    def u(k, shape):
        return jax.random.uniform(k, shape, jnp.float32, -stdv, stdv)

    # PyTorch layout: W_ih (4H, K), W_hh (4H, H); gate order i, f, g, o.
    w_ih1 = u(ks[0], (4 * H, I));  w_hh1 = u(ks[1], (4 * H, H))
    b_ih1 = u(ks[2], (4 * H,));    b_hh1 = u(ks[3], (4 * H,))
    w_ih2 = u(ks[4], (4 * H, H));  w_hh2 = u(ks[5], (4 * H, H))
    b_ih2 = u(ks[6], (4 * H,));    b_hh2 = u(ks[7], (4 * H,))
    w_fc = u(ks[8], (O, H));       b_fc = u(ks[9], (O,))

    w_fc_pad = jnp.zeros((H, OP), jnp.float32).at[:, :O].set(w_fc.T)
    b_fc_pad = jnp.zeros((1, OP), jnp.float32).at[0, :O].set(b_fc)

    kernel_params = {
        "w_ih1": w_ih1.T,                                   # (I, 4H)  f32
        "b1": (b_ih1 + b_hh1)[None, :],                     # (1, 4H)  f32
        "w_hh1": w_hh1.T.astype(jnp.bfloat16),              # (H, 4H)  bf16
        "w_ih2": w_ih2.T.astype(jnp.bfloat16),              # (H, 4H)  bf16
        "w_hh2": w_hh2.T.astype(jnp.bfloat16),              # (H, 4H)  bf16
        "b2": (b_ih2 + b_hh2)[None, :],                     # (1, 4H)  f32
        "w_fc": w_fc_pad.astype(jnp.bfloat16),              # (H, OP)  bf16
        "b_fc": b_fc_pad,                                   # (1, OP)  f32
    }
    ref_params = {
        "w_ih1_t": w_ih1.T, "w_hh1_t": w_hh1.T, "b1": (b_ih1 + b_hh1)[None, :],
        "w_ih2_t": w_ih2.T, "w_hh2_t": w_hh2.T, "b2": (b_ih2 + b_hh2)[None, :],
        "w_fc_t": w_fc.T, "b_fc": b_fc[None, :],
    }
    return kernel_params, ref_params


def _reference_forward(x, rp):
    """Pure-JAX reference of the same 2-layer LSTM + FC.

    Matmul operands are cast to bf16 (f32 accumulation) to mirror the kernel's MXU
    numerics; the layer-1 input projection and all elementwise math are f32,
    identical to the kernel and to the PyTorch eval-mode forward structure.
    """
    B, T, _ = x.shape
    H = rp["w_hh1_t"].shape[0]

    def bdot(a, b):
        return jnp.dot(a.astype(jnp.bfloat16), b.astype(jnp.bfloat16),
                       preferred_element_type=jnp.float32)

    def sigmoid(z):
        return 0.5 * jnp.tanh(0.5 * z) + 0.5

    def gates_to_hc(g, c):
        i_g = sigmoid(g[:, 0 * H:1 * H])
        f_g = sigmoid(g[:, 1 * H:2 * H])
        g_g = jnp.tanh(g[:, 2 * H:3 * H])
        o_g = sigmoid(g[:, 3 * H:4 * H])
        c_new = f_g * c + i_g * g_g
        return o_g * jnp.tanh(c_new), c_new

    h1 = c1 = h2 = c2 = jnp.zeros((B, H), jnp.float32)
    for t in range(T):
        pre1 = x[:, t, :] @ rp["w_ih1_t"] + rp["b1"]         # f32, like the kernel
        h1, c1 = gates_to_hc(pre1 + bdot(h1, rp["w_hh1_t"]), c1)
        g2 = bdot(h1, rp["w_ih2_t"]) + bdot(h2, rp["w_hh2_t"]) + rp["b2"]
        h2, c2 = gates_to_hc(g2, c2)
    return bdot(h2, rp["w_fc_t"]) + rp["b_fc"]


if __name__ == "__main__":
    # Small shapes consistent with the module: input_size=8, hidden=32, layers=2, output=96.
    B, T, I = 2, 8, 8
    H, O = 32, 96

    key = jax.random.PRNGKey(0)
    k_x, k_p = jax.random.split(key)
    x = jax.random.normal(k_x, (B, T, I), jnp.float32)
    kparams, rparams = init_params(k_p, I, H, O)

    out = lstm_heat_forecaster(x, kparams, out_size=O)
    out = jax.block_until_ready(out)

    ref = _reference_forward(x, rparams)
    assert out.shape == (B, O)
    err = float(jnp.max(jnp.abs(out - ref)))
    assert err < 5e-3, f"Pallas kernel mismatch vs reference: max|diff|={err}"

    print("KERNEL_OK")
</pallas_src>

<mosaic_0001>
module attributes {stable_mosaic.version = 11 : i64} {
  func.func @_lstm_fc_kernel(%arg0: memref<64x8xf32, #tpu.memory_space<vmem>>, %arg1: memref<8x128xf32, #tpu.memory_space<vmem>>, %arg2: memref<1x128xf32, #tpu.memory_space<vmem>>, %arg3: memref<32x128xbf16, #tpu.memory_space<vmem>>, %arg4: memref<32x128xbf16, #tpu.memory_space<vmem>>, %arg5: memref<32x128xbf16, #tpu.memory_space<vmem>>, %arg6: memref<1x128xf32, #tpu.memory_space<vmem>>, %arg7: memref<32x128xbf16, #tpu.memory_space<vmem>>, %arg8: memref<1x128xf32, #tpu.memory_space<vmem>>, %arg9: memref<8x128xf32, #tpu.memory_space<vmem>>, %arg10: memref<64x128xf32, #tpu.memory_space<vmem>>) attributes {dimension_semantics = [], scalar_prefetch = 0 : i64, scratch_operands = 1 : i64, tpu.core_type = #tpu.core_type<tc>} {
    %c0 = arith.constant 0 : index
    %c0_0 = arith.constant 0 : index
    %0 = vector.load %arg0[%c0, %c0_0] : memref<64x8xf32, #tpu.memory_space<vmem>>, vector<64x8xf32>
    %c0_1 = arith.constant 0 : index
    %c0_2 = arith.constant 0 : index
    %1 = vector.load %arg1[%c0_1, %c0_2] : memref<8x128xf32, #tpu.memory_space<vmem>>, vector<8x128xf32>
    %cst = arith.constant dense<0.000000e+00> : vector<64x128xf32>
    %2 = tpu.matmul %0, %1, %cst {dimension_numbers = #tpu.dot_dimension_numbers<[1], [0], [0], [1], [0, 0, 1, 1], [], []>} : vector<64x8xf32>, vector<8x128xf32>, vector<64x128xf32> -> vector<64x128xf32>
    %c0_3 = arith.constant 0 : index
    %c0_4 = arith.constant 0 : index
    %3 = vector.load %arg2[%c0_3, %c0_4] : memref<1x128xf32, #tpu.memory_space<vmem>>, vector<1x128xf32>
    %4 = vector.broadcast %3 : vector<1x128xf32> to vector<64x128xf32>
    %5 = arith.addf %2, %4 : vector<64x128xf32>
    %c0_5 = arith.constant 0 : index
    %c0_6 = arith.constant 0 : index
    %6 = vector.load %arg10[%c0_5, %c0_6] : memref<64x128xf32, #tpu.memory_space<vmem>>, vector<64x128xf32>
    tpu.vector_store %arg10[%c0_5, %c0_6], %5 {strides = array<i32>} : memref<64x128xf32, #tpu.memory_space<vmem>>, vector<64x128xf32>,
    %c0_7 = arith.constant 0 : index
    %c0_8 = arith.constant 0 : index
    %7 = vector.load %arg3[%c0_7, %c0_8] : memref<32x128xbf16, #tpu.memory_space<vmem>>, vector<32x128xbf16>
    %c0_9 = arith.constant 0 : index
    %c0_10 = arith.constant 0 : index
    %8 = vector.load %arg4[%c0_9, %c0_10] : memref<32x128xbf16, #tpu.memory_space<vmem>>, vector<32x128xbf16>
    %c0_11 = arith.constant 0 : index
    %c0_12 = arith.constant 0 : index
    %9 = vector.load %arg5[%c0_11, %c0_12] : memref<32x128xbf16, #tpu.memory_space<vmem>>, vector<32x128xbf16>
    %c0_13 = arith.constant 0 : index
    %c0_14 = arith.constant 0 : index
    %10 = vector.load %arg6[%c0_13, %c0_14] : memref<1x128xf32, #tpu.memory_space<vmem>>, vector<1x128xf32>
    %11 = vector.shape_cast %10 : vector<1x128xf32> to vector<1x128xf32>
    %12 = vector.broadcast %11 : vector<1x128xf32> to vector<8x128xf32>
    %cst_15 = arith.constant 0.000000e+00 : f32
    %13 = vector.broadcast %cst_15 : f32 to vector<8x32xf32>
    %c0_i32 = arith.constant 0 : i32
    %c8_i32 = arith.constant 8 : i32
    %14 = arith.muli %c0_i32, %c8_i32 : i32
    %15 = tpu.assume_multiple %14, 8 : i32
    %16 = arith.index_cast %15 : i32 to index
    %c0_16 = arith.constant 0 : index
    %17 = vector.load %arg10[%16, %c0_16] : memref<64x128xf32, #tpu.memory_space<vmem>>, vector<8x128xf32>
    %18 = arith.truncf %13 : vector<8x32xf32> to vector<8x32xbf16>
    %cst_17 = arith.constant dense<0.000000e+00> : vector<8x128xf32>
    %19 = tpu.matmul %18, %7, %cst_17 {dimension_numbers = #tpu.dot_dimension_numbers<[1], [0], [0], [1], [0, 0, 1, 1], [], []>} : vector<8x32xbf16>, vector<32x128xbf16>, vector<8x128xf32> -> vector<8x128xf32>
    %20 = arith.addf %17, %19 : vector<8x128xf32>
    %cst_18 = arith.constant 5.000000e-01 : f32
    %21 = vector.broadcast %cst_18 : f32 to vector<8x128xf32>
    %22 = arith.mulf %21, %20 : vector<8x128xf32>
    %23 = math.tanh %22 : vector<8x128xf32>
    %cst_19 = arith.constant 5.000000e-01 : f32
    %24 = vector.broadcast %cst_19 : f32 to vector<8x128xf32>
    %25 = arith.mulf %24, %23 : vector<8x128xf32>
    %cst_20 = arith.constant 5.000000e-01 : f32
    %26 = vector.broadcast %cst_20 : f32 to vector<8x128xf32>
    %27 = arith.addf %25, %26 : vector<8x128xf32>
    %28 = vector.extract_strided_slice %27 {offsets = [0, 0], sizes = [8, 32], strides = [1, 1]} : vector<8x128xf32> to vector<8x32xf32>
    %29 = vector.extract_strided_slice %27 {offsets = [0, 32], sizes = [8, 32], strides = [1, 1]} : vector<8x128xf32> to vector<8x32xf32>
    %30 = vector.extract_strided_slice %27 {offsets = [0, 96], sizes = [8, 32], strides = [1, 1]} : vector<8x128xf32> to vector<8x32xf32>
    %31 = vector.extract_strided_slice %20 {offsets = [0, 64], sizes = [8, 32], strides = [1, 1]} : vector<8x128xf32> to vector<8x32xf32>
    %32 = math.tanh %31 : vector<8x32xf32>
    %33 = arith.mulf %29, %13 : vector<8x32xf32>
    %34 = arith.mulf %28, %32 : vector<8x32xf32>
    %35 = arith.addf %33, %34 : vector<8x32xf32>
    %36 = math.tanh %35 : vector<8x32xf32>
    %37 = arith.mulf %30, %36 : vector<8x32xf32>
    %38 = arith.truncf %37 : vector<8x32xf32> to vector<8x32xbf16>
    %cst_21 = arith.constant dense<0.000000e+00> : vector<8x128xf32>
    %39 = tpu.matmul %38, %8, %cst_21 {dimension_numbers = #tpu.dot_dimension_numbers<[1], [0], [0], [1], [0, 0, 1, 1], [], []>} : vector<8x32xbf16>, vector<32x128xbf16>, vector<8x128xf32> -> vector<8x128xf32>
    %40 = arith.addf %39, %12 : vector<8x128xf32>
    %cst_22 = arith.constant 5.000000e-01 : f32
    %41 = vector.broadcast %cst_22 : f32 to vector<8x128xf32>
    %42 = arith.mulf %41, %40 : vector<8x128xf32>
    %43 = math.tanh %42 : vector<8x128xf32>
    %cst_23 = arith.constant 5.000000e-01 : f32
    %44 = vector.broadcast %cst_23 : f32 to vector<8x128xf32>
    %45 = arith.mulf %44, %43 : vector<8x128xf32>
    %cst_24 = arith.constant 5.000000e-01 : f32
    %46 = vector.broadcast %cst_24 : f32 to vector<8x128xf32>
    %47 = arith.addf %45, %46 : vector<8x128xf32>
    %48 = vector.extract_strided_slice %47 {offsets = [0, 0], sizes = [8, 32], strides = [1, 1]} : vector<8x128xf32> to vector<8x32xf32>
    %49 = vector.extract_strided_slice %47 {offsets = [0, 32], sizes = [8, 32], strides = [1, 1]} : vector<8x128xf32> to vector<8x32xf32>
    %50 = vector.extract_strided_slice %47 {offsets = [0, 96], sizes = [8, 32], strides = [1, 1]} : vector<8x128xf32> to vector<8x32xf32>
    %51 = vector.extract_strided_slice %40 {offsets = [0, 64], sizes = [8, 32], strides = [1, 1]} : vector<8x128xf32> to vector<8x32xf32>
    %52 = math.tanh %51 : vector<8x32xf32>
    %53 = arith.mulf %49, %13 : vector<8x32xf32>
    %54 = arith.mulf %48, %52 : vector<8x32xf32>
    %55 = arith.addf %53, %54 : vector<8x32xf32>
    %56 = math.tanh %55 : vector<8x32xf32>
    %57 = arith.mulf %50, %56 : vector<8x32xf32>
    %58 = arith.truncf %57 : vector<8x32xf32> to vector<8x32xbf16>
    %cst_25 = arith.constant dense<0.000000e+00> : vector<8x128xf32>
    %59 = tpu.matmul %58, %9, %cst_25 {dimension_numbers = #tpu.dot_dimension_numbers<[1], [0], [0], [1], [0, 0, 1, 1], [], []>} : vector<8x32xbf16>, vector<32x128xbf16>, vector<8x128xf32> -> vector<8x128xf32>
    %60 = arith.addf %59, %12 : vector<8x128xf32>
    %c1_i32 = arith.constant 1 : i32
    %c8_i32_26 = arith.constant 8 : i32
    %61 = arith.muli %c1_i32, %c8_i32_26 : i32
    %62 = tpu.assume_multiple %61, 8 : i32
    %63 = arith.index_cast %62 : i32 to index
    %c0_27 = arith.constant 0 : index
    %64 = vector.load %arg10[%63, %c0_27] : memref<64x128xf32, #tpu.memory_space<vmem>>, vector<8x128xf32>
    %65 = arith.truncf %37 : vector<8x32xf32> to vector<8x32xbf16>
    %cst_28 = arith.constant dense<0.000000e+00> : vector<8x128xf32>
    %66 = tpu.matmul %65, %7, %cst_28 {dimension_numbers = #tpu.dot_dimension_numbers<[1], [0], [0], [1], [0, 0, 1, 1], [], []>} : vector<8x32xbf16>, vector<32x128xbf16>, vector<8x128xf32> -> vector<8x128xf32>
    %67 = arith.addf %64, %66 : vector<8x128xf32>
    %cst_29 = arith.constant 5.000000e-01 : f32
    %68 = vector.broadcast %cst_29 : f32 to vector<8x128xf32>
    %69 = arith.mulf %68, %67 : vector<8x128xf32>
    %70 = math.tanh %69 : vector<8x128xf32>
    %cst_30 = arith.constant 5.000000e-01 : f32
    %71 = vector.broadcast %cst_30 : f32 to vector<8x128xf32>
    %72 = arith.mulf %71, %70 : vector<8x128xf32>
    %cst_31 = arith.constant 5.000000e-01 : f32
    %73 = vector.broadcast %cst_31 : f32 to vector<8x128xf32>
    %74 = arith.addf %72, %73 : vector<8x128xf32>
    %75 = vector.extract_strided_slice %74 {offsets = [0, 0], sizes = [8, 32], strides = [1, 1]} : vector<8x128xf32> to vector<8x32xf32>
    %76 = vector.extract_strided_slice %74 {offsets = [0, 32], sizes = [8, 32], strides = [1, 1]} : vector<8x128xf32> to vector<8x32xf32>
    %77 = vector.extract_strided_slice %74 {offsets = [0, 96], sizes = [8, 32], strides = [1, 1]} : vector<8x128xf32> to vector<8x32xf32>
    %78 = vector.extract_strided_slice %67 {offsets = [0, 64], sizes = [8, 32], strides = [1, 1]} : vector<8x128xf32> to vector<8x32xf32>
    %79 = math.tanh %78 : vector<8x32xf32>
    %80 = arith.mulf %76, %35 : vector<8x32xf32>
    %81 = arith.mulf %75, %79 : vector<8x32xf32>
    %82 = arith.addf %80, %81 : vector<8x32xf32>
    %83 = math.tanh %82 : vector<8x32xf32>
    %84 = arith.mulf %77, %83 : vector<8x32xf32>
    %85 = arith.truncf %84 : vector<8x32xf32> to vector<8x32xbf16>
    %cst_32 = arith.constant dense<0.000000e+00> : vector<8x128xf32>
    %86 = tpu.matmul %85, %8, %cst_32 {dimension_numbers = #tpu.dot_dimension_numbers<[1], [0], [0], [1], [0, 0, 1, 1], [], []>} : vector<8x32xbf16>, vector<32x128xbf16>, vector<8x128xf32> -> vector<8x128xf32>
    %87 = arith.addf %86, %60 : vector<8x128xf32>
    %cst_33 = arith.constant 5.000000e-01 : f32
    %88 = vector.broadcast %cst_33 : f32 to vector<8x128xf32>
    %89 = arith.mulf %88, %87 : vector<8x128xf32>
    %90 = math.tanh %89 : vector<8x128xf32>
    %cst_34 = arith.constant 5.000000e-01 : f32
    %91 = vector.broadcast %cst_34 : f32 to vector<8x128xf32>
    %92 = arith.mulf %91, %90 : vector<8x128xf32>
    %cst_35 = arith.constant 5.000000e-01 : f32
    %93 = vector.broadcast %cst_35 : f32 to vector<8x128xf32>
    %94 = arith.addf %92, %93 : vector<8x128xf32>
    %95 = vector.extract_strided_slice %94 {offsets = [0, 0], sizes = [8, 32], strides = [1, 1]} : vector<8x128xf32> to vector<8x32xf32>
    %96 = vector.extract_strided_slice %94 {offsets = [0, 32], sizes = [8, 32], strides = [1, 1]} : vector<8x128xf32> to vector<8x32xf32>
    %97 = vector.extract_strided_slice %94 {offsets = [0, 96], sizes = [8, 32], strides = [1, 1]} : vector<8x128xf32> to vector<8x32xf32>
    %98 = vector.extract_strided_slice %87 {offsets = [0, 64], sizes = [8, 32], strides = [1, 1]} : vector<8x128xf32> to vector<8x32xf32>
    %99 = math.tanh %98 : vector<8x32xf32>
    %100 = arith.mulf %96, %55 : vector<8x32xf32>
    %101 = arith.mulf %95, %99 : vector<8x32xf32>
    %102 = arith.addf %100, %101 : vector<8x32xf32>
    %103 = math.tanh %102 : vector<8x32xf32>
    %104 = arith.mulf %97, %103 : vector<8x32xf32>
    %105 = arith.truncf %104 : vector<8x32xf32> to vector<8x32xbf16>
    %cst_36 = arith.constant dense<0.000000e+00> : vector<8x128xf32>
    %106 = tpu.matmul %105, %9, %cst_36 {dimension_numbers = #tpu.dot_dimension_numbers<[1], [0], [0], [1], [0, 0, 1, 1], [], []>} : vector<8x32xbf16>, vector<32x128xbf16>, vector<8x128xf32> -> vector<8x128xf32>
    %107 = arith.addf %106, %12 : vector<8x128xf32>
    %c2_i32 = arith.constant 2 : i32
    %c8_i32_37 = arith.constant 8 : i32
    %108 = arith.muli %c2_i32, %c8_i32_37 : i32
    %109 = tpu.assume_multiple %108, 8 : i32
    %110 = arith.index_cast %109 : i32 to index
    %c0_38 = arith.constant 0 : index
    %111 = vector.load %arg10[%110, %c0_38] : memref<64x128xf32, #tpu.memory_space<vmem>>, vector<8x128xf32>
    %112 = arith.truncf %84 : vector<8x32xf32> to vector<8x32xbf16>
    %cst_39 = arith.constant dense<0.000000e+00> : vector<8x128xf32>
    %113 = tpu.matmul %112, %7, %cst_39 {dimension_numbers = #tpu.dot_dimension_numbers<[1], [0], [0], [1], [0, 0, 1, 1], [], []>} : vector<8x32xbf16>, vector<32x128xbf16>, vector<8x128xf32> -> vector<8x128xf32>
    %114 = arith.addf %111, %113 : vector<8x128xf32>
    %cst_40 = arith.constant 5.000000e-01 : f32
    %115 = vector.broadcast %cst_40 : f32 to vector<8x128xf32>
    %116 = arith.mulf %115, %114 : vector<8x128xf32>
    %117 = math.tanh %116 : vector<8x128xf32>
    %cst_41 = arith.constant 5.000000e-01 : f32
    %118 = vector.broadcast %cst_41 : f32 to vector<8x128xf32>
    %119 = arith.mulf %118, %117 : vector<8x128xf32>
    %cst_42 = arith.constant 5.000000e-01 : f32
    %120 = vector.broadcast %cst_42 : f32 to vector<8x128xf32>
    %121 = arith.addf %119, %120 : vector<8x128xf32>
    %122 = vector.extract_strided_slice %121 {offsets = [0, 0], sizes = [8, 32], strides = [1, 1]} : vector<8x128xf32> to vector<8x32xf32>
    %123 = vector.extract_strided_slice %121 {offsets = [0, 32], sizes = [8, 32], strides = [1, 1]} : vector<8x128xf32> to vector<8x32xf32>
    %124 = vector.extract_strided_slice %121 {offsets = [0, 96], sizes = [8, 32], strides = [1, 1]} : vector<8x128xf32> to vector<8x32xf32>
    %125 = vector.extract_strided_slice %114 {offsets = [0, 64], sizes = [8, 32], strides = [1, 1]} : vector<8x128xf32> to vector<8x32xf32>
    %126 = math.tanh %125 : vector<8x32xf32>
    %127 = arith.mulf %123, %82 : vector<8x32xf32>
    %128 = arith.mulf %122, %126 : vector<8x32xf32>
    %129 = arith.addf %127, %128 : vector<8x32xf32>
    %130 = math.tanh %129 : vector<8x32xf32>
    %131 = arith.mulf %124, %130 : vector<8x32xf32>
    %132 = arith.truncf %131 : vector<8x32xf32> to vector<8x32xbf16>
    %cst_43 = arith.constant dense<0.000000e+00> : vector<8x128xf32>
    %133 = tpu.matmul %132, %8, %cst_43 {dimension_numbers = #tpu.dot_dimension_numbers<[1], [0], [0], [1], [0, 0, 1, 1], [], []>} : vector<8x32xbf16>, vector<32x128xbf16>, vector<8x128xf32> -> vector<8x128xf32>
    %134 = arith.addf %133, %107 : vector<8x128xf32>
    %cst_44 = arith.constant 5.000000e-01 : f32
    %135 = vector.broadcast %cst_44 : f32 to vector<8x128xf32>
    %136 = arith.mulf %135, %134 : vector<8x128xf32>
    %137 = math.tanh %136 : vector<8x128xf32>
    %cst_45 = arith.constant 5.000000e-01 : f32
    %138 = vector.broadcast %cst_45 : f32 to vector<8x128xf32>
    %139 = arith.mulf %138, %137 : vector<8x128xf32>
    %cst_46 = arith.constant 5.000000e-01 : f32
    %140 = vector.broadcast %cst_46 : f32 to vector<8x128xf32>
    %141 = arith.addf %139, %140 : vector<8x128xf32>
    %142 = vector.extract_strided_slice %141 {offsets = [0, 0], sizes = [8, 32], strides = [1, 1]} : vector<8x128xf32> to vector<8x32xf32>
    %143 = vector.extract_strided_slice %141 {offsets = [0, 32], sizes = [8, 32], strides = [1, 1]} : vector<8x128xf32> to vector<8x32xf32>
    %144 = vector.extract_strided_slice %141 {offsets = [0, 96], sizes = [8, 32], strides = [1, 1]} : vector<8x128xf32> to vector<8x32xf32>
    %145 = vector.extract_strided_slice %134 {offsets = [0, 64], sizes = [8, 32], strides = [1, 1]} : vector<8x128xf32> to vector<8x32xf32>
    %146 = math.tanh %145 : vector<8x32xf32>
    %147 = arith.mulf %143, %102 : vector<8x32xf32>
    %148 = arith.mulf %142, %146 : vector<8x32xf32>
    %149 = arith.addf %147, %148 : vector<8x32xf32>
    %150 = math.tanh %149 : vector<8x32xf32>
    %151 = arith.mulf %144, %150 : vector<8x32xf32>
    %152 = arith.truncf %151 : vector<8x32xf32> to vector<8x32xbf16>
    %cst_47 = arith.constant dense<0.000000e+00> : vector<8x128xf32>
    %153 = tpu.matmul %152, %9, %cst_47 {dimension_numbers = #tpu.dot_dimension_numbers<[1], [0], [0], [1], [0, 0, 1, 1], [], []>} : vector<8x32xbf16>, vector<32x128xbf16>, vector<8x128xf32> -> vector<8x128xf32>
    %154 = arith.addf %153, %12 : vector<8x128xf32>
    %c3_i32 = arith.constant 3 : i32
    %c8_i32_48 = arith.constant 8 : i32
    %155 = arith.muli %c3_i32, %c8_i32_48 : i32
    %156 = tpu.assume_multiple %155, 8 : i32
    %157 = arith.index_cast %156 : i32 to index
    %c0_49 = arith.constant 0 : index
    %158 = vector.load %arg10[%157, %c0_49] : memref<64x128xf32, #tpu.memory_space<vmem>>, vector<8x128xf32>
    %159 = arith.truncf %131 : vector<8x32xf32> to vector<8x32xbf16>
    %cst_50 = arith.constant dense<0.000000e+00> : vector<8x128xf32>
    %160 = tpu.matmul %159, %7, %cst_50 {dimension_numbers = #tpu.dot_dimension_numbers<[1], [0], [0], [1], [0, 0, 1, 1], [], []>} : vector<8x32xbf16>, vector<32x128xbf16>, vector<8x128xf32> -> vector<8x128xf32>
    %161 = arith.addf %158, %160 : vector<8x128xf32>
    %cst_51 = arith.constant 5.000000e-01 : f32
    %162 = vector.broadcast %cst_51 : f32 to vector<8x128xf32>
    %163 = arith.mulf %162, %161 : vector<8x128xf32>
    %164 = math.tanh %163 : vector<8x128xf32>
    %cst_52 = arith.constant 5.000000e-01 : f32
    %165 = vector.broadcast %cst_52 : f32 to vector<8x128xf32>
    %166 = arith.mulf %165, %164 : vector<8x128xf32>
    %cst_53 = arith.constant 5.000000e-01 : f32
    %167 = vector.broadcast %cst_53 : f32 to vector<8x128xf32>
    %168 = arith.addf %166, %167 : vector<8x128xf32>
    %169 = vector.extract_strided_slice %168 {offsets = [0, 0], sizes = [8, 32], strides = [1, 1]} : vector<8x128xf32> to vector<8x32xf32>
    %170 = vector.extract_strided_slice %168 {offsets = [0, 32], sizes = [8, 32], strides = [1, 1]} : vector<8x128xf32> to vector<8x32xf32>
    %171 = vector.extract_strided_slice %168 {offsets = [0, 96], sizes = [8, 32], strides = [1, 1]} : vector<8x128xf32> to vector<8x32xf32>
    %172 = vector.extract_strided_slice %161 {offsets = [0, 64], sizes = [8, 32], strides = [1, 1]} : vector<8x128xf32> to vector<8x32xf32>
    %173 = math.tanh %172 : vector<8x32xf32>
    %174 = arith.mulf %170, %129 : vector<8x32xf32>
    %175 = arith.mulf %169, %173 : vector<8x32xf32>
    %176 = arith.addf %174, %175 : vector<8x32xf32>
    %177 = math.tanh %176 : vector<8x32xf32>
    %178 = arith.mulf %171, %177 : vector<8x32xf32>
    %179 = arith.truncf %178 : vector<8x32xf32> to vector<8x32xbf16>
    %cst_54 = arith.constant dense<0.000000e+00> : vector<8x128xf32>
    %180 = tpu.matmul %179, %8, %cst_54 {dimension_numbers = #tpu.dot_dimension_numbers<[1], [0], [0], [1], [0, 0, 1, 1], [], []>} : vector<8x32xbf16>, vector<32x128xbf16>, vector<8x128xf32> -> vector<8x128xf32>
    %181 = arith.addf %180, %154 : vector<8x128xf32>
    %cst_55 = arith.constant 5.000000e-01 : f32
    %182 = vector.broadcast %cst_55 : f32 to vector<8x128xf32>
    %183 = arith.mulf %182, %181 : vector<8x128xf32>
    %184 = math.tanh %183 : vector<8x128xf32>
    %cst_56 = arith.constant 5.000000e-01 : f32
    %185 = vector.broadcast %cst_56 : f32 to vector<8x128xf32>
    %186 = arith.mulf %185, %184 : vector<8x128xf32>
    %cst_57 = arith.constant 5.000000e-01 : f32
    %187 = vector.broadcast %cst_57 : f32 to vector<8x128xf32>
    %188 = arith.addf %186, %187 : vector<8x128xf32>
    %189 = vector.extract_strided_slice %188 {offsets = [0, 0], sizes = [8, 32], strides = [1, 1]} : vector<8x128xf32> to vector<8x32xf32>
    %190 = vector.extract_strided_slice %188 {offsets = [0, 32], sizes = [8, 32], strides = [1, 1]} : vector<8x128xf32> to vector<8x32xf32>
    %191 = vector.extract_strided_slice %188 {offsets = [0, 96], sizes = [8, 32], strides = [1, 1]} : vector<8x128xf32> to vector<8x32xf32>
    %192 = vector.extract_strided_slice %181 {offsets = [0, 64], sizes = [8, 32], strides = [1, 1]} : vector<8x128xf32> to vector<8x32xf32>
    %193 = math.tanh %192 : vector<8x32xf32>
    %194 = arith.mulf %190, %149 : vector<8x32xf32>
    %195 = arith.mulf %189, %193 : vector<8x32xf32>
    %196 = arith.addf %194, %195 : vector<8x32xf32>
    %197 = math.tanh %196 : vector<8x32xf32>
    %198 = arith.mulf %191, %197 : vector<8x32xf32>
    %199 = arith.truncf %198 : vector<8x32xf32> to vector<8x32xbf16>
    %cst_58 = arith.constant dense<0.000000e+00> : vector<8x128xf32>
    %200 = tpu.matmul %199, %9, %cst_58 {dimension_numbers = #tpu.dot_dimension_numbers<[1], [0], [0], [1], [0, 0, 1, 1], [], []>} : vector<8x32xbf16>, vector<32x128xbf16>, vector<8x128xf32> -> vector<8x128xf32>
    %201 = arith.addf %200, %12 : vector<8x128xf32>
    %c4_i32 = arith.constant 4 : i32
    %c8_i32_59 = arith.constant 8 : i32
    %202 = arith.muli %c4_i32, %c8_i32_59 : i32
    %203 = tpu.assume_multiple %202, 8 : i32
    %204 = arith.index_cast %203 : i32 to index
    %c0_60 = arith.constant 0 : index
    %205 = vector.load %arg10[%204, %c0_60] : memref<64x128xf32, #tpu.memory_space<vmem>>, vector<8x128xf32>
    %206 = arith.truncf %178 : vector<8x32xf32> to vector<8x32xbf16>
    %cst_61 = arith.constant dense<0.000000e+00> : vector<8x128xf32>
    %207 = tpu.matmul %206, %7, %cst_61 {dimension_numbers = #tpu.dot_dimension_numbers<[1], [0], [0], [1], [0, 0, 1, 1], [], []>} : vector<8x32xbf16>, vector<32x128xbf16>, vector<8x128xf32> -> vector<8x128xf32>
    %208 = arith.addf %205, %207 : vector<8x128xf32>
    %cst_62 = arith.constant 5.000000e-01 : f32
    %209 = vector.broadcast %cst_62 : f32 to vector<8x128xf32>
    %210 = arith.mulf %209, %208 : vector<8x128xf32>
    %211 = math.tanh %210 : vector<8x128xf32>
    %cst_63 = arith.constant 5.000000e-01 : f32
    %212 = vector.broadcast %cst_63 : f32 to vector<8x128xf32>
    %213 = arith.mulf %212, %211 : vector<8x128xf32>
    %cst_64 = arith.constant 5.000000e-01 : f32
    %214 = vector.broadcast %cst_64 : f32 to vector<8x128xf32>
    %215 = arith.addf %213, %214 : vector<8x128xf32>
    %216 = vector.extract_strided_slice %215 {offsets = [0, 0], sizes = [8, 32], strides = [1, 1]} : vector<8x128xf32> to vector<8x32xf32>
    %217 = vector.extract_strided_slice %215 {offsets = [0, 32], sizes = [8, 32], strides = [1, 1]} : vector<8x128xf32> to vector<8x32xf32>
    %218 = vector.extract_strided_slice %215 {offsets = [0, 96], sizes = [8, 32], strides = [1, 1]} : vector<8x128xf32> to vector<8x32xf32>
    %219 = vector.extract_strided_slice %208 {offsets = [0, 64], sizes = [8, 32], strides = [1, 1]} : vector<8x128xf32> to vector<8x32xf32>
    %220 = math.tanh %219 : vector<8x32xf32>
    %221 = arith.mulf %217, %176 : vector<8x32xf32>
    %222 = arith.mulf %216, %220 : vector<8x32xf32>
    %223 = arith.addf %221, %222 : vector<8x32xf32>
    %224 = math.tanh %223 : vector<8x32xf32>
    %225 = arith.mulf %218, %224 : vector<8x32xf32>
    %226 = arith.truncf %225 : vector<8x32xf32> to vector<8x32xbf16>
    %cst_65 = arith.constant dense<0.000000e+00> : vector<8x128xf32>
    %227 = tpu.matmul %226, %8, %cst_65 {dimension_numbers = #tpu.dot_dimension_numbers<[1], [0], [0], [1], [0, 0, 1, 1], [], []>} : vector<8x32xbf16>, vector<32x128xbf16>, vector<8x128xf32> -> vector<8x128xf32>
    %228 = arith.addf %227, %201 : vector<8x128xf32>
    %cst_66 = arith.constant 5.000000e-01 : f32
    %229 = vector.broadcast %cst_66 : f32 to vector<8x128xf32>
    %230 = arith.mulf %229, %228 : vector<8x128xf32>
    %231 = math.tanh %230 : vector<8x128xf32>
    %cst_67 = arith.constant 5.000000e-01 : f32
    %232 = vector.broadcast %cst_67 : f32 to vector<8x128xf32>
    %233 = arith.mulf %232, %231 : vector<8x128xf32>
    %cst_68 = arith.constant 5.000000e-01 : f32
    %234 = vector.broadcast %cst_68 : f32 to vector<8x128xf32>
    %235 = arith.addf %233, %234 : vector<8x128xf32>
    %236 = vector.extract_strided_slice %235 {offsets = [0, 0], sizes = [8, 32], strides = [1, 1]} : vector<8x128xf32> to vector<8x32xf32>
    %237 = vector.extract_strided_slice %235 {offsets = [0, 32], sizes = [8, 32], strides = [1, 1]} : vector<8x128xf32> to vector<8x32xf32>
    %238 = vector.extract_strided_slice %235 {offsets = [0, 96], sizes = [8, 32], strides = [1, 1]} : vector<8x128xf32> to vector<8x32xf32>
    %239 = vector.extract_strided_slice %228 {offsets = [0, 64], sizes = [8, 32], strides = [1, 1]} : vector<8x128xf32> to vector<8x32xf32>
    %240 = math.tanh %239 : vector<8x32xf32>
    %241 = arith.mulf %237, %196 : vector<8x32xf32>
    %242 = arith.mulf %236, %240 : vector<8x32xf32>
    %243 = arith.addf %241, %242 : vector<8x32xf32>
    %244 = math.tanh %243 : vector<8x32xf32>
    %245 = arith.mulf %238, %244 : vector<8x32xf32>
    %246 = arith.truncf %245 : vector<8x32xf32> to vector<8x32xbf16>
    %cst_69 = arith.constant dense<0.000000e+00> : vector<8x128xf32>
    %247 = tpu.matmul %246, %9, %cst_69 {dimension_numbers = #tpu.dot_dimension_numbers<[1], [0], [0], [1], [0, 0, 1, 1], [], []>} : vector<8x32xbf16>, vector<32x128xbf16>, vector<8x128xf32> -> vector<8x128xf32>
    %248 = arith.addf %247, %12 : vector<8x128xf32>
    %c5_i32 = arith.constant 5 : i32
    %c8_i32_70 = arith.constant 8 : i32
    %249 = arith.muli %c5_i32, %c8_i32_70 : i32
    %250 = tpu.assume_multiple %249, 8 : i32
    %251 = arith.index_cast %250 : i32 to index
    %c0_71 = arith.constant 0 : index
    %252 = vector.load %arg10[%251, %c0_71] : memref<64x128xf32, #tpu.memory_space<vmem>>, vector<8x128xf32>
    %253 = arith.truncf %225 : vector<8x32xf32> to vector<8x32xbf16>
    %cst_72 = arith.constant dense<0.000000e+00> : vector<8x128xf32>
    %254 = tpu.matmul %253, %7, %cst_72 {dimension_numbers = #tpu.dot_dimension_numbers<[1], [0], [0], [1], [0, 0, 1, 1], [], []>} : vector<8x32xbf16>, vector<32x128xbf16>, vector<8x128xf32> -> vector<8x128xf32>
    %255 = arith.addf %252, %254 : vector<8x128xf32>
    %cst_73 = arith.constant 5.000000e-01 : f32
    %256 = vector.broadcast %cst_73 : f32 to vector<8x128xf32>
    %257 = arith.mulf %256, %255 : vector<8x128xf32>
    %258 = math.tanh %257 : vector<8x128xf32>
    %cst_74 = arith.constant 5.000000e-01 : f32
    %259 = vector.broadcast %cst_74 : f32 to vector<8x128xf32>
    %260 = arith.mulf %259, %258 : vector<8x128xf32>
    %cst_75 = arith.constant 5.000000e-01 : f32
    %261 = vector.broadcast %cst_75 : f32 to vector<8x128xf32>
    %262 = arith.addf %260, %261 : vector<8x128xf32>
    %263 = vector.extract_strided_slice %262 {offsets = [0, 0], sizes = [8, 32], strides = [1, 1]} : vector<8x128xf32> to vector<8x32xf32>
    %264 = vector.extract_strided_slice %262 {offsets = [0, 32], sizes = [8, 32], strides = [1, 1]} : vector<8x128xf32> to vector<8x32xf32>
    %265 = vector.extract_strided_slice %262 {offsets = [0, 96], sizes = [8, 32], strides = [1, 1]} : vector<8x128xf32> to vector<8x32xf32>
    %266 = vector.extract_strided_slice %255 {offsets = [0, 64], sizes = [8, 32], strides = [1, 1]} : vector<8x128xf32> to vector<8x32xf32>
    %267 = math.tanh %266 : vector<8x32xf32>
    %268 = arith.mulf %264, %223 : vector<8x32xf32>
    %269 = arith.mulf %263, %267 : vector<8x32xf32>
    %270 = arith.addf %268, %269 : vector<8x32xf32>
    %271 = math.tanh %270 : vector<8x32xf32>
    %272 = arith.mulf %265, %271 : vector<8x32xf32>
    %273 = arith.truncf %272 : vector<8x32xf32> to vector<8x32xbf16>
    %cst_76 = arith.constant dense<0.000000e+00> : vector<8x128xf32>
    %274 = tpu.matmul %273, %8, %cst_76 {dimension_numbers = #tpu.dot_dimension_numbers<[1], [0], [0], [1], [0, 0, 1, 1], [], []>} : vector<8x32xbf16>, vector<32x128xbf16>, vector<8x128xf32> -> vector<8x128xf32>
    %275 = arith.addf %274, %248 : vector<8x128xf32>
    %cst_77 = arith.constant 5.000000e-01 : f32
    %276 = vector.broadcast %cst_77 : f32 to vector<8x128xf32>
    %277 = arith.mulf %276, %275 : vector<8x128xf32>
    %278 = math.tanh %277 : vector<8x128xf32>
    %cst_78 = arith.constant 5.000000e-01 : f32
    %279 = vector.broadcast %cst_78 : f32 to vector<8x128xf32>
    %280 = arith.mulf %279, %278 : vector<8x128xf32>
    %cst_79 = arith.constant 5.000000e-01 : f32
    %281 = vector.broadcast %cst_79 : f32 to vector<8x128xf32>
    %282 = arith.addf %280, %281 : vector<8x128xf32>
    %283 = vector.extract_strided_slice %282 {offsets = [0, 0], sizes = [8, 32], strides = [1, 1]} : vector<8x128xf32> to vector<8x32xf32>
    %284 = vector.extract_strided_slice %282 {offsets = [0, 32], sizes = [8, 32], strides = [1, 1]} : vector<8x128xf32> to vector<8x32xf32>
    %285 = vector.extract_strided_slice %282 {offsets = [0, 96], sizes = [8, 32], strides = [1, 1]} : vector<8x128xf32> to vector<8x32xf32>
    %286 = vector.extract_strided_slice %275 {offsets = [0, 64], sizes = [8, 32], strides = [1, 1]} : vector<8x128xf32> to vector<8x32xf32>
    %287 = math.tanh %286 : vector<8x32xf32>
    %288 = arith.mulf %284, %243 : vector<8x32xf32>
    %289 = arith.mulf %283, %287 : vector<8x32xf32>
    %290 = arith.addf %288, %289 : vector<8x32xf32>
    %291 = math.tanh %290 : vector<8x32xf32>
    %292 = arith.mulf %285, %291 : vector<8x32xf32>
    %293 = arith.truncf %292 : vector<8x32xf32> to vector<8x32xbf16>
    %cst_80 = arith.constant dense<0.000000e+00> : vector<8x128xf32>
    %294 = tpu.matmul %293, %9, %cst_80 {dimension_numbers = #tpu.dot_dimension_numbers<[1], [0], [0], [1], [0, 0, 1, 1], [], []>} : vector<8x32xbf16>, vector<32x128xbf16>, vector<8x128xf32> -> vector<8x128xf32>
    %295 = arith.addf %294, %12 : vector<8x128xf32>
    %c6_i32 = arith.constant 6 : i32
    %c8_i32_81 = arith.constant 8 : i32
    %296 = arith.muli %c6_i32, %c8_i32_81 : i32
    %297 = tpu.assume_multiple %296, 8 : i32
    %298 = arith.index_cast %297 : i32 to index
    %c0_82 = arith.constant 0 : index
    %299 = vector.load %arg10[%298, %c0_82] : memref<64x128xf32, #tpu.memory_space<vmem>>, vector<8x128xf32>
    %300 = arith.truncf %272 : vector<8x32xf32> to vector<8x32xbf16>
    %cst_83 = arith.constant dense<0.000000e+00> : vector<8x128xf32>
    %301 = tpu.matmul %300, %7, %cst_83 {dimension_numbers = #tpu.dot_dimension_numbers<[1], [0], [0], [1], [0, 0, 1, 1], [], []>} : vector<8x32xbf16>, vector<32x128xbf16>, vector<8x128xf32> -> vector<8x128xf32>
    %302 = arith.addf %299, %301 : vector<8x128xf32>
    %cst_84 = arith.constant 5.000000e-01 : f32
    %303 = vector.broadcast %cst_84 : f32 to vector<8x128xf32>
    %304 = arith.mulf %303, %302 : vector<8x128xf32>
    %305 = math.tanh %304 : vector<8x128xf32>
    %cst_85 = arith.constant 5.000000e-01 : f32
    %306 = vector.broadcast %cst_85 : f32 to vector<8x128xf32>
    %307 = arith.mulf %306, %305 : vector<8x128xf32>
    %cst_86 = arith.constant 5.000000e-01 : f32
    %308 = vector.broadcast %cst_86 : f32 to vector<8x128xf32>
    %309 = arith.addf %307, %308 : vector<8x128xf32>
    %310 = vector.extract_strided_slice %309 {offsets = [0, 0], sizes = [8, 32], strides = [1, 1]} : vector<8x128xf32> to vector<8x32xf32>
    %311 = vector.extract_strided_slice %309 {offsets = [0, 32], sizes = [8, 32], strides = [1, 1]} : vector<8x128xf32> to vector<8x32xf32>
    %312 = vector.extract_strided_slice %309 {offsets = [0, 96], sizes = [8, 32], strides = [1, 1]} : vector<8x128xf32> to vector<8x32xf32>
    %313 = vector.extract_strided_slice %302 {offsets = [0, 64], sizes = [8, 32], strides = [1, 1]} : vector<8x128xf32> to vector<8x32xf32>
    %314 = math.tanh %313 : vector<8x32xf32>
    %315 = arith.mulf %311, %270 : vector<8x32xf32>
    %316 = arith.mulf %310, %314 : vector<8x32xf32>
    %317 = arith.addf %315, %316 : vector<8x32xf32>
    %318 = math.tanh %317 : vector<8x32xf32>
    %319 = arith.mulf %312, %318 : vector<8x32xf32>
    %320 = arith.truncf %319 : vector<8x32xf32> to vector<8x32xbf16>
    %cst_87 = arith.constant dense<0.000000e+00> : vector<8x128xf32>
    %321 = tpu.matmul %320, %8, %cst_87 {dimension_numbers = #tpu.dot_dimension_numbers<[1], [0], [0], [1], [0, 0, 1, 1], [], []>} : vector<8x32xbf16>, vector<32x128xbf16>, vector<8x128xf32> -> vector<8x128xf32>
    %322 = arith.addf %321, %295 : vector<8x128xf32>
    %cst_88 = arith.constant 5.000000e-01 : f32
    %323 = vector.broadcast %cst_88 : f32 to vector<8x128xf32>
    %324 = arith.mulf %323, %322 : vector<8x128xf32>
    %325 = math.tanh %324 : vector<8x128xf32>
    %cst_89 = arith.constant 5.000000e-01 : f32
    %326 = vector.broadcast %cst_89 : f32 to vector<8x128xf32>
    %327 = arith.mulf %326, %325 : vector<8x128xf32>
    %cst_90 = arith.constant 5.000000e-01 : f32
    %328 = vector.broadcast %cst_90 : f32 to vector<8x128xf32>
    %329 = arith.addf %327, %328 : vector<8x128xf32>
    %330 = vector.extract_strided_slice %329 {offsets = [0, 0], sizes = [8, 32], strides = [1, 1]} : vector<8x128xf32> to vector<8x32xf32>
    %331 = vector.extract_strided_slice %329 {offsets = [0, 32], sizes = [8, 32], strides = [1, 1]} : vector<8x128xf32> to vector<8x32xf32>
    %332 = vector.extract_strided_slice %329 {offsets = [0, 96], sizes = [8, 32], strides = [1, 1]} : vector<8x128xf32> to vector<8x32xf32>
    %333 = vector.extract_strided_slice %322 {offsets = [0, 64], sizes = [8, 32], strides = [1, 1]} : vector<8x128xf32> to vector<8x32xf32>
    %334 = math.tanh %333 : vector<8x32xf32>
    %335 = arith.mulf %331, %290 : vector<8x32xf32>
    %336 = arith.mulf %330, %334 : vector<8x32xf32>
    %337 = arith.addf %335, %336 : vector<8x32xf32>
    %338 = math.tanh %337 : vector<8x32xf32>
    %339 = arith.mulf %332, %338 : vector<8x32xf32>
    %340 = arith.truncf %339 : vector<8x32xf32> to vector<8x32xbf16>
    %cst_91 = arith.constant dense<0.000000e+00> : vector<8x128xf32>
    %341 = tpu.matmul %340, %9, %cst_91 {dimension_numbers = #tpu.dot_dimension_numbers<[1], [0], [0], [1], [0, 0, 1, 1], [], []>} : vector<8x32xbf16>, vector<32x128xbf16>, vector<8x128xf32> -> vector<8x128xf32>
    %342 = arith.addf %341, %12 : vector<8x128xf32>
    %c7_i32 = arith.constant 7 : i32
    %c8_i32_92 = arith.constant 8 : i32
    %343 = arith.muli %c7_i32, %c8_i32_92 : i32
    %344 = tpu.assume_multiple %343, 8 : i32
    %345 = arith.index_cast %344 : i32 to index
    %c0_93 = arith.constant 0 : index
    %346 = vector.load %arg10[%345, %c0_93] : memref<64x128xf32, #tpu.memory_space<vmem>>, vector<8x128xf32>
    %347 = arith.truncf %319 : vector<8x32xf32> to vector<8x32xbf16>
    %cst_94 = arith.constant dense<0.000000e+00> : vector<8x128xf32>
    %348 = tpu.matmul %347, %7, %cst_94 {dimension_numbers = #tpu.dot_dimension_numbers<[1], [0], [0], [1], [0, 0, 1, 1], [], []>} : vector<8x32xbf16>, vector<32x128xbf16>, vector<8x128xf32> -> vector<8x128xf32>
    %349 = arith.addf %346, %348 : vector<8x128xf32>
    %cst_95 = arith.constant 5.000000e-01 : f32
    %350 = vector.broadcast %cst_95 : f32 to vector<8x128xf32>
    %351 = arith.mulf %350, %349 : vector<8x128xf32>
    %352 = math.tanh %351 : vector<8x128xf32>
    %cst_96 = arith.constant 5.000000e-01 : f32
    %353 = vector.broadcast %cst_96 : f32 to vector<8x128xf32>
    %354 = arith.mulf %353, %352 : vector<8x128xf32>
    %cst_97 = arith.constant 5.000000e-01 : f32
    %355 = vector.broadcast %cst_97 : f32 to vector<8x128xf32>
    %356 = arith.addf %354, %355 : vector<8x128xf32>
    %357 = vector.extract_strided_slice %356 {offsets = [0, 0], sizes = [8, 32], strides = [1, 1]} : vector<8x128xf32> to vector<8x32xf32>
    %358 = vector.extract_strided_slice %356 {offsets = [0, 32], sizes = [8, 32], strides = [1, 1]} : vector<8x128xf32> to vector<8x32xf32>
    %359 = vector.extract_strided_slice %356 {offsets = [0, 96], sizes = [8, 32], strides = [1, 1]} : vector<8x128xf32> to vector<8x32xf32>
    %360 = vector.extract_strided_slice %349 {offsets = [0, 64], sizes = [8, 32], strides = [1, 1]} : vector<8x128xf32> to vector<8x32xf32>
    %361 = math.tanh %360 : vector<8x32xf32>
    %362 = arith.mulf %358, %317 : vector<8x32xf32>
    %363 = arith.mulf %357, %361 : vector<8x32xf32>
    %364 = arith.addf %362, %363 : vector<8x32xf32>
    %365 = math.tanh %364 : vector<8x32xf32>
    %366 = arith.mulf %359, %365 : vector<8x32xf32>
    %367 = arith.truncf %366 : vector<8x32xf32> to vector<8x32xbf16>
    %cst_98 = arith.constant dense<0.000000e+00> : vector<8x128xf32>
    %368 = tpu.matmul %367, %8, %cst_98 {dimension_numbers = #tpu.dot_dimension_numbers<[1], [0], [0], [1], [0, 0, 1, 1], [], []>} : vector<8x32xbf16>, vector<32x128xbf16>, vector<8x128xf32> -> vector<8x128xf32>
    %369 = arith.addf %368, %342 : vector<8x128xf32>
    %cst_99 = arith.constant 5.000000e-01 : f32
    %370 = vector.broadcast %cst_99 : f32 to vector<8x128xf32>
    %371 = arith.mulf %370, %369 : vector<8x128xf32>
    %372 = math.tanh %371 : vector<8x128xf32>
    %cst_100 = arith.constant 5.000000e-01 : f32
    %373 = vector.broadcast %cst_100 : f32 to vector<8x128xf32>
    %374 = arith.mulf %373, %372 : vector<8x128xf32>
    %cst_101 = arith.constant 5.000000e-01 : f32
    %375 = vector.broadcast %cst_101 : f32 to vector<8x128xf32>
    %376 = arith.addf %374, %375 : vector<8x128xf32>
    %377 = vector.extract_strided_slice %376 {offsets = [0, 0], sizes = [8, 32], strides = [1, 1]} : vector<8x128xf32> to vector<8x32xf32>
    %378 = vector.extract_strided_slice %376 {offsets = [0, 32], sizes = [8, 32], strides = [1, 1]} : vector<8x128xf32> to vector<8x32xf32>
    %379 = vector.extract_strided_slice %376 {offsets = [0, 96], sizes = [8, 32], strides = [1, 1]} : vector<8x128xf32> to vector<8x32xf32>
    %380 = vector.extract_strided_slice %369 {offsets = [0, 64], sizes = [8, 32], strides = [1, 1]} : vector<8x128xf32> to vector<8x32xf32>
    %381 = math.tanh %380 : vector<8x32xf32>
    %382 = arith.mulf %378, %337 : vector<8x32xf32>
    %383 = arith.mulf %377, %381 : vector<8x32xf32>
    %384 = arith.addf %382, %383 : vector<8x32xf32>
    %385 = math.tanh %384 : vector<8x32xf32>
    %386 = arith.mulf %379, %385 : vector<8x32xf32>
    %387 = arith.truncf %386 : vector<8x32xf32> to vector<8x32xbf16>
    %cst_102 = arith.constant dense<0.000000e+00> : vector<8x128xf32>
    %388 = tpu.matmul %387, %9, %cst_102 {dimension_numbers = #tpu.dot_dimension_numbers<[1], [0], [0], [1], [0, 0, 1, 1], [], []>} : vector<8x32xbf16>, vector<32x128xbf16>, vector<8x128xf32> -> vector<8x128xf32>
    %389 = arith.addf %388, %12 : vector<8x128xf32>
    %c8_i32_103 = arith.constant 8 : i32
    %390 = arith.truncf %386 : vector<8x32xf32> to vector<8x32xbf16>
    %c0_104 = arith.constant 0 : index
    %c0_105 = arith.constant 0 : index
    %391 = vector.load %arg7[%c0_104, %c0_105] : memref<32x128xbf16, #tpu.memory_space<vmem>>, vector<32x128xbf16>
    %cst_106 = arith.constant dense<0.000000e+00> : vector<8x128xf32>
    %392 = tpu.matmul %390, %391, %cst_106 {dimension_numbers = #tpu.dot_dimension_numbers<[1], [0], [0], [1], [0, 0, 1, 1], [], []>} : vector<8x32xbf16>, vector<32x128xbf16>, vector<8x128xf32> -> vector<8x128xf32>
    %c0_107 = arith.constant 0 : index
    %c0_108 = arith.constant 0 : index
    %393 = vector.load %arg8[%c0_107, %c0_108] : memref<1x128xf32, #tpu.memory_space<vmem>>, vector<1x128xf32>
    %394 = vector.broadcast %393 : vector<1x128xf32> to vector<8x128xf32>
    %395 = arith.addf %392, %394 : vector<8x128xf32>
    %c0_109 = arith.constant 0 : index
    %c0_110 = arith.constant 0 : index
    %396 = vector.load %arg9[%c0_109, %c0_110] : memref<8x128xf32, #tpu.memory_space<vmem>>, vector<8x128xf32>
    tpu.vector_store %arg9[%c0_109, %c0_110], %395 {strides = array<i32>} : memref<8x128xf32, #tpu.memory_space<vmem>>, vector<8x128xf32>,
    return
  }
}

</mosaic_0001>

<bundles_post_ra>
// kernel: lstm_heat_forecaster.1
= control target key start
LH: loop header
LB: loop body
LE: loop exit
PB: predicated region body
PF: predicated region fallthrough
CT: control target
= control target key end

     0   :  { %v2200_v0 = vmov 0.0   ;;  %vm49_vm0 = vcmask 64512   ;;  %vm2201_vm1 = vmmov 0   ;;  %v2202_v6 = vmov 0   ;;  %s2203_s20 = smov 64   ;;  %s2204_s21 = smov 32   ;;  %s2666_s3 = inlined_call_operand.vmem [shape: bf16[32,128], index: 3, kind: input, shape index: {}]   ;;  %s2667_s1 = inlined_call_operand.vmem [shape: f32[8,128], index: 1, kind: input, shape index: {}]   ;;  %s2668_s0 = inlined_call_operand.vmem [shape: f32[64,8], index: 0, kind: input, shape index: {}]   ;;  %s2669_s2 = inlined_call_operand.vmem [shape: f32[1,128], index: 2, kind: input, shape index: {}]   ;;  %s2670_s4 = inlined_call_operand.vmem [shape: bf16[32,128], index: 4, kind: input, shape index: {}]   ;;  %s2671_s6 = inlined_call_operand.vmem [shape: f32[1,128], index: 6, kind: input, shape index: {}]   ;;  %s2672_s5 = inlined_call_operand.vmem [shape: bf16[32,128], index: 5, kind: input, shape index: {}]   ;;  %s2673_s7 = inlined_call_operand.vmem [shape: bf16[32,128], index: 7, kind: input, shape index: {}]   ;;  %s2674_s8 = inlined_call_operand.vmem [shape: f32[1,128], index: 8, kind: input, shape index: {}]   ;;  %s2675_s9 = inlined_call_operand.vmem [shape: f32[8,128], index: 9, kind: output, shape index: {}]  }
   0x1   :  { %1858 = vmatprep.subr.bf16.mxu1 %v2200_v0  ;;  %v2259_v1 = vld [vmem:[%s2666_s3] sm:$0xff]   ;;  %1862 = vmatprep.mubr.msk.bf16.mxu1 %vm2201_vm1, %v2200_v0  ;;  %v34_v4 = vld [vmem:[%s2668_s0 + $0x8] sm:$0xff]  ;;  %vm219_vm2 = vcmask 261120  }
   0x2   :  { %v41_v2 = vld [vmem:[%s2667_s1] sm:$0xff]  ;;  %1859 = vmatpush3.bf16.msra.mxu1 %v2259_v1  ;;  %v2276_v5 = vld [vmem:[%s2666_s3 + $0x8] sm:$0xff]  }
   0x3   :  { %v33_v3 = vld [vmem:[%s2668_s0] sm:$0xff]  ;;  %1844 = vmatprep.subr.mxu0 %v41_v2  ;;  %1860 = vmatprep.subr.bf16.mxu1 %v2200_v0  ;;  %v2306_v27 = vld [vmem:[%s2670_s4 + $0x8] sm:$0xff]  }
   0x4   :  { %1845 = vmatpush3.msra.mxu0 %v41_v2  ;;  %1846 = vmatprep.mubr.msk.f32.mxu0 %vm49_vm0, %v33_v3  ;;  %v2289_v7 = vld [vmem:[%s2669_s2] ss:$0 sm:$0xff] }
   0x5   :  { %1847 = vmatmul.mubr.msk.f32.vlgmr.msra.gmra.mrb[0].mxu0 %vm49_vm0, %v34_v4  ;;  %1874 = vmatprep.subr.bf16.mxu0 %v2200_v0  ;;  %v2300_v26 = vld [vmem:[%s2670_s4] sm:$0xff]   ;;  %v35_v4 = vld [vmem:[%s2668_s0 + $0x10] sm:$0xff] }
   0x6   :  { %1861 = vmatpush3.bf16.msra.mxu1 %v2276_v5  ;;  %v2326_v33 = vld [vmem:[%s2671_s6] ss:$0 sm:$0xff]  ;;  %1849 = vmatprep.mubr.msk.f32.mxu0 %vm49_vm0, %v35_v4 }
   0x7   :  { %1866 = vmatprep.subr.bf16.mxu1 %v2200_v0 }
   0x9   :  { %1863 = vmatmul.mubr.bf16.vlgmr.msra.gmra.mrb[0].mxu1 %v2202_v6  ;;  %v36_v6 = vld [vmem:[%s2668_s0 + $0x18] sm:$0xff] }
   0xa   :  { %1870 = vmatprep.mubr.msk.bf16.mxu1 %vm2201_vm1, %v2200_v0  ;;  %1867 = vmatpush3.bf16.msra.mxu1 %v2300_v26 }
   0xb   :  { %1868 = vmatprep.subr.bf16.mxu1 %v2200_v0  ;;  %1850 = vmatmul.mubr.msk.f32.gmra.mrb[2].mxu0 %vm49_vm0, %v36_v6 }
   0xe   :  { %1869 = vmatpush3.bf16.msra.mxu1 %v2306_v27 }
   0xf   :  { %1882 = vmatprep.subr.bf16.mxu1 %v2200_v0 }
  0xd8   :  { %v1848_v8 = vpop.f32.mrb[0].mxu0 }
  0xd9   :  { %v140_v9 = vpop.f32.mrb[1].mxu0  ;;  %v146_v39 = vadd.f32 %v1848_v8, %v2289_v7  ;;  %v37_v8 = vld [vmem:[%s2668_s0 + $0x20] sm:$0xff] }
  0xda   :  { %v141_v10 = vadd.f32 %v2289_v7, %v140_v9  ;;  %v2354_v9 = vld [vmem:[%s2672_s5] sm:$0xff]   ;;  %1852 = vmatprep.mubr.msk.f32.mxu0 %vm49_vm0, %v37_v8 }
  0xdb   :  { %1875 = vmatpush3.bf16.msra.mxu0 %v2354_v9 }
  0xdc   :  { %v257_v11 = vpop.f32.mrb[0].mxu1  ;;  %1876 = vmatprep.subr.bf16.mxu0 %v2200_v0 }
  0xdd   :  { %v263_v12 = vadd.f32 %v257_v11, %v141_v10  ;;  %v1864_v13 = vpop.f32.mrb[1].mxu1  ;;  %v38_v10 = vld [vmem:[%s2668_s0 + $0x28] sm:$0xff] }
  0xde   :  { %v260_v14 = vpop.f32.mrb[2].mxu1  ;;  %v2366_v11 = vld [vmem:[%s2672_s5 + $0x8] sm:$0xff]   ;;  %1853 = vmatmul.mubr.msk.f32.gmra.mrb[4].mxu0 %vm49_vm0, %v38_v10  ;;  %v40_v13 = vld [vmem:[%s2668_s0 + $0x38] sm:$0xff] }
  0xdf   :  { %2098 = vtanh.f32 %v263_v12  ;;  %v1865_v15 = vpop.f32.mrb[3].mxu1  ;;  %v264_v17 = vmul.f32 0.5, %v263_v12  ;;  %v39_v12 = vld [vmem:[%s2668_s0 + $0x30] sm:$0xff]  ;;  %1877 = vmatpush3.bf16.msra.mxu0 %v2366_v11 }
  0xe0   :  { %1855 = vmatprep.mubr.msk.f32.mxu0 %vm49_vm0, %v39_v12  ;;  %1890 = vmatprep.subr.bf16.mxu0 %v2200_v0 }
  0xe1   :  { %2100 = vtanh.f32 %v264_v17 }
  0xe2   :  { %1856 = vmatmul.mubr.msk.f32.gmra.mrb[6].mxu0 %vm49_vm0, %v40_v13 }
  0xe3   :  { %1878 = vmatprep.mubr.msk.bf16.mxu0 %vm2201_vm1, %v2200_v0 }
  0xe9   :  { %v2099_v16 = vpop.eup %2098 }
  0xea   :  { %271 = vrot.lane.b32.xlu0 %v2099_v16, %s2203_s20 }
  0xeb   :  { %v2101_v18 = vpop.eup %2100 }
  0xec   :  { %v266_v19 = vmul.f32 0.5, %v2101_v18 }
  0xee   :  { %v267_v20 = vadd.f32 0.5, %v266_v19 }
  0xf0   :  { %v269_v23 = vmul.f32 0.0, %v267_v20 }
 0x15c   :  { %v272_v21 = vpop.permute.xlu0 %271 }
 0x15d   :  { %v274_v22 = vmul.f32 %v272_v21, %v267_v20  ;;  %v2389_v21 = vpop.f32.mrb[2].mxu0 }
 0x15f   :  { %276 = vrot.lane.b32.xlu0 %v274_v22, %s2204_s21  ;;  %v150_v22 = vpop.f32.mrb[3].mxu0 }
 0x1d1   :  { %v277_v24 = vpop.permute.xlu0 %276 }
 0x1d2   :  { %v2294_v25 = vadd.f32 %v277_v24, %v269_v23  ;;  %v2391_v23 = vpop.f32.mrb[4].mxu0 }
 0x1d3   :  { %v2393_v24 = vpop.f32.mrb[5].mxu0 }
 0x1d4   :  { %2102 = vtanh.f32 %v2294_v25 }
 0x1de   :  { %v2103_v28 = vpop.eup %2102 }
 0x1df   :  { %282 = vrot.lane.b32.xlu1 %v2103_v28, %s2203_s20 }
 0x251   :  { %v283_v29 = vpop.permute.xlu1 %282 }
 0x252   :  { %v285_v30 = vmul.f32 %v283_v29, %v267_v20 }
 0x254   :  { %v286_v31 = vpack.c.bf16 %v285_v30, %v285_v30 }
 0x256   :  { %288 = vrot.lane.b32.xlu1 %v286_v31, %s2204_s21 }
 0x2c8   :  { %v289_v32 = vpop.permute.xlu1 %288 }
 0x2c9   :  { %1871 = vmatmul.mubr.msk.bf16.vlgmr.msra.gmra.mrb[4].mxu1 %vm219_vm2, %v289_v32 }
 0x2ca   :  { %1883 = vmatpush3.bf16.msra.mxu1 %v2259_v1  ;;  %1886 = vmatprep.mubr.msk.bf16.mxu1 %vm2201_vm1, %v2200_v0 }
 0x2cb   :  { %1884 = vmatprep.subr.bf16.mxu1 %v2200_v0 }
 0x2ce   :  { %1885 = vmatpush3.bf16.msra.mxu1 %v2276_v5 }
 0x2cf   :  { %1898 = vmatprep.subr.bf16.mxu1 %v2200_v0 }
 0x2d1   :  { %1887 = vmatmul.mubr.msk.bf16.vlgmr.msra.gmra.mrb[8].mxu1 %vm219_vm2, %v289_v32 }
 0x2d2   :  { %1902 = vmatprep.mubr.msk.bf16.mxu1 %vm2201_vm1, %v2200_v0  ;;  %1899 = vmatpush3.bf16.msra.mxu1 %v2354_v9 }
 0x2d3   :  { %1900 = vmatprep.subr.bf16.mxu1 %v2200_v0 }
 0x2d6   :  { %1901 = vmatpush3.bf16.msra.mxu1 %v2366_v11 }
 0x2d7   :  { %1914 = vmatprep.subr.bf16.mxu1 %v2200_v0 }
 0x39c   :  { %v339_v34 = vpop.f32.mrb[4].mxu1 }
 0x39d   :  { %v340_v35 = vadd.f32 %v2326_v33, %v339_v34  ;;  %v1872_v36 = vpop.f32.mrb[5].mxu1 }
 0x39e   :  { %v342_v37 = vpop.f32.mrb[6].mxu1 }
 0x39f   :  { %2104 = vtanh.f32 %v340_v35  ;;  %v1873_v38 = vpop.f32.mrb[7].mxu1  ;;  %v345_v47 = vmul.f32 0.5, %v340_v35  ;;  %v151_v37 = vadd.f32 %v2289_v7, %v150_v22 }
 0x3a4   :  { %v462_v40 = vpop.f32.mrb[8].mxu1 }
 0x3a5   :  { %v468_v41 = vadd.f32 %v462_v40, %v146_v39  ;;  %v1888_v42 = vpop.f32.mrb[9].mxu1 }
 0x3a6   :  { %v465_v43 = vpop.f32.mrb[10].mxu1 }
 0x3a7   :  { %2106 = vtanh.f32 %v468_v41  ;;  %v1889_v44 = vpop.f32.mrb[11].mxu1  ;;  %v469_v48 = vmul.f32 0.5, %v468_v41 }
 0x3a8   :  { %2108 = vtanh.f32 %v345_v47 }
 0x3a9   :  { %v2105_v45 = vpop.eup %2104  ;;  %2110 = vtanh.f32 %v469_v48 }
 0x3aa   :  { %352 = vrot.lane.b32.xlu0 %v2105_v45, %s2203_s20 }
 0x3b1   :  { %v2107_v46 = vpop.eup %2106 }
 0x3b2   :  { %476 = vrot.lane.b32.xlu1 %v2107_v46, %s2203_s20  ;;  %v2109_v49 = vpop.eup %2108 }
 0x3b3   :  { %v347_v50 = vmul.f32 0.5, %v2109_v49  ;;  %v2111_v52 = vpop.eup %2110 }
 0x3b4   :  { %v471_v55 = vmul.f32 0.5, %v2111_v52 }
 0x3b5   :  { %v348_v51 = vadd.f32 0.5, %v347_v50 }
 0x3b6   :  { %v472_v56 = vadd.f32 0.5, %v471_v55 }
 0x3b7   :  { %v350_v59 = vmul.f32 0.0, %v348_v51 }
 0x3b8   :  { %v474_v62 = vmul.f32 %v472_v56, %v2294_v25  ;;  %v2395_v25 = vpop.f32.mrb[6].mxu0 }
 0x3b9   :  { %v2397_v28 = vpop.f32.mrb[7].mxu0 }
 0x41c   :  { %v353_v53 = vpop.permute.xlu0 %352 }
 0x41d   :  { %v355_v54 = vmul.f32 %v353_v53, %v348_v51 }
 0x41f   :  { %357 = vrot.lane.b32.xlu0 %v355_v54, %s2204_s21 }
 0x424   :  { %v477_v57 = vpop.permute.xlu1 %476 }
 0x425   :  { %v479_v58 = vmul.f32 %v477_v57, %v472_v56 }
 0x427   :  { %481 = vrot.lane.b32.xlu1 %v479_v58, %s2204_s21 }
 0x491   :  { %v358_v60 = vpop.permute.xlu0 %357 }
 0x492   :  { %v2334_v61 = vadd.f32 %v358_v60, %v350_v59 }
 0x494   :  { %2112 = vtanh.f32 %v2334_v61 }
 0x499   :  { %v482_v63 = vpop.permute.xlu1 %481 }
 0x49a   :  { %v2338_v2 = vadd.f32 %v482_v63, %v474_v62 }
 0x49c   :  { %2114 = vtanh.f32 %v2338_v2 }
 0x49e   :  { %v2113_v3 = vpop.eup %2112 }
 0x49f   :  { %363 = vrot.lane.b32.xlu0 %v2113_v3, %s2203_s20 }
 0x4a6   :  { %v2115_v14 = vpop.eup %2114 }
 0x4a7   :  { %487 = vrot.lane.b32.xlu1 %v2115_v14, %s2203_s20 }
 0x511   :  { %v364_v15 = vpop.permute.xlu0 %363 }
 0x512   :  { %v366_v16 = vmul.f32 %v364_v15, %v348_v51 }
 0x514   :  { %v367_v17 = vpack.c.bf16 %v366_v16, %v366_v16 }
 0x516   :  { %369 = vrot.lane.b32.xlu0 %v367_v17, %s2204_s21 }
 0x519   :  { %v488_v18 = vpop.permute.xlu1 %487 }
 0x51a   :  { %v490_v19 = vmul.f32 %v488_v18, %v472_v56 }
 0x51c   :  { %v491_v20 = vpack.c.bf16 %v490_v19, %v490_v19 }
 0x51e   :  { %493 = vrot.lane.b32.xlu1 %v491_v20, %s2204_s21  ;;  %v156_v20 = vadd.f32 %v2389_v21, %v2289_v7 }
 0x588   :  { %v370_v29 = vpop.permute.xlu0 %369 }
 0x589   :  { %1879 = vmatmul.mubr.msk.bf16.vlgmr.msra.gmra.mrb[8].mxu0 %vm219_vm2, %v370_v29 }
 0x58a   :  { %1891 = vmatpush3.bf16.msra.mxu0 %v2300_v26  ;;  %1894 = vmatprep.mubr.msk.bf16.mxu0 %vm2201_vm1, %v2200_v0 }
 0x58b   :  { %1892 = vmatprep.subr.bf16.mxu0 %v2200_v0 }
 0x58e   :  { %1893 = vmatpush3.bf16.msra.mxu0 %v2306_v27 }
 0x58f   :  { %1906 = vmatprep.subr.bf16.mxu0 %v2200_v0 }
 0x590   :  { %v494_v30 = vpop.permute.xlu1 %493 }
 0x595   :  { %1895 = vmatmul.mubr.msk.bf16.vlgmr.msra.gmra.mrb[8].mxu0 %vm219_vm2, %v494_v30 }
 0x596   :  { %1907 = vmatpush3.bf16.msra.mxu0 %v2259_v1  ;;  %1910 = vmatprep.mubr.msk.bf16.mxu0 %vm2201_vm1, %v2200_v0 }
 0x597   :  { %1908 = vmatprep.subr.bf16.mxu0 %v2200_v0 }
 0x59a   :  { %1909 = vmatpush3.bf16.msra.mxu0 %v2276_v5 }
 0x59b   :  { %1922 = vmatprep.subr.bf16.mxu0 %v2200_v0 }
 0x59d   :  { %1911 = vmatmul.mubr.msk.bf16.vlgmr.msra.gmra.mrb[12].mxu0 %vm219_vm2, %v494_v30 }
 0x59e   :  { %1923 = vmatpush3.bf16.msra.mxu0 %v2354_v9  ;;  %1926 = vmatprep.mubr.msk.bf16.mxu0 %vm2201_vm1, %v2200_v0 }
 0x59f   :  { %1924 = vmatprep.subr.bf16.mxu0 %v2200_v0 }
 0x5a2   :  { %1925 = vmatpush3.bf16.msra.mxu0 %v2366_v11 }
 0x5a3   :  { %1938 = vmatprep.subr.bf16.mxu0 %v2200_v0 }
 0x668   :  { %v532_v31 = vpop.f32.mrb[8].mxu0 }
 0x669   :  { %v2050_v32 = vadd.f32 %v2326_v33, %v532_v31  ;;  %v1896_v34 = vpop.f32.mrb[9].mxu0 }
 0x66a   :  { %v535_v35 = vpop.f32.mrb[10].mxu0 }
 0x66b   :  { %2116 = vtanh.f32 %v2050_v32  ;;  %v1897_v36 = vpop.f32.mrb[11].mxu0  ;;  %v538_v45 = vmul.f32 0.5, %v2050_v32 }
 0x670   :  { %v643_v38 = vpop.f32.mrb[12].mxu0 }
 0x671   :  { %v649_v39 = vadd.f32 %v643_v38, %v151_v37  ;;  %v1912_v40 = vpop.f32.mrb[13].mxu0 }
 0x672   :  { %v646_v41 = vpop.f32.mrb[14].mxu0 }
 0x673   :  { %2118 = vtanh.f32 %v649_v39  ;;  %v1913_v42 = vpop.f32.mrb[15].mxu0  ;;  %v650_v46 = vmul.f32 0.5, %v649_v39 }
 0x674   :  { %2120 = vtanh.f32 %v538_v45 }
 0x675   :  { %v2117_v43 = vpop.eup %2116  ;;  %2122 = vtanh.f32 %v650_v46 }
 0x676   :  { %545 = vrot.lane.b32.xlu0 %v2117_v43, %s2203_s20 }
 0x67d   :  { %v2119_v44 = vpop.eup %2118 }
 0x67e   :  { %657 = vrot.lane.b32.xlu1 %v2119_v44, %s2203_s20  ;;  %v2121_v47 = vpop.eup %2120 }
 0x67f   :  { %v540_v48 = vmul.f32 0.5, %v2121_v47  ;;  %v2123_v50 = vpop.eup %2122 }
 0x680   :  { %v652_v53 = vmul.f32 0.5, %v2123_v50 }
 0x681   :  { %v541_v49 = vadd.f32 0.5, %v540_v48 }
 0x682   :  { %v653_v54 = vadd.f32 0.5, %v652_v53 }
 0x683   :  { %v543_v57 = vmul.f32 %v541_v49, %v2334_v61 }
 0x684   :  { %v655_v60 = vmul.f32 %v653_v54, %v2338_v2 }
 0x6e8   :  { %v546_v51 = vpop.permute.xlu0 %545 }
 0x6e9   :  { %v548_v52 = vmul.f32 %v546_v51, %v541_v49 }
 0x6eb   :  { %550 = vrot.lane.b32.xlu0 %v548_v52, %s2204_s21 }
 0x6f0   :  { %v658_v55 = vpop.permute.xlu1 %657 }
 0x6f1   :  { %v660_v56 = vmul.f32 %v658_v55, %v653_v54 }
 0x6f3   :  { %662 = vrot.lane.b32.xlu1 %v660_v56, %s2204_s21 }
 0x75d   :  { %v551_v58 = vpop.permute.xlu0 %550 }
 0x75e   :  { %v2427_v59 = vadd.f32 %v551_v58, %v543_v57 }
 0x760   :  { %2124 = vtanh.f32 %v2427_v59 }
 0x765   :  { %v663_v62 = vpop.permute.xlu1 %662 }
 0x766   :  { %v2431_v63 = vadd.f32 %v663_v62, %v655_v60 }
 0x768   :  { %2126 = vtanh.f32 %v2431_v63 }
 0x76a   :  { %v2125_v3 = vpop.eup %2124 }
 0x76b   :  { %556 = vrot.lane.b32.xlu0 %v2125_v3, %s2203_s20 }
 0x772   :  { %v2127_v4 = vpop.eup %2126 }
 0x773   :  { %668 = vrot.lane.b32.xlu1 %v2127_v4, %s2203_s20 }
 0x7dd   :  { %v557_v6 = vpop.permute.xlu0 %556 }
 0x7de   :  { %v559_v61 = vmul.f32 %v557_v6, %v541_v49 }
 0x7e0   :  { %v560_v8 = vpack.c.bf16 %v559_v61, %v559_v61 }
 0x7e2   :  { %562 = vrot.lane.b32.xlu0 %v560_v8, %s2204_s21 }
 0x7e5   :  { %v669_v10 = vpop.permute.xlu1 %668 }
 0x7e6   :  { %v671_v12 = vmul.f32 %v669_v10, %v653_v54  ;;  %v161_v10 = vadd.f32 %v2289_v7, %v2393_v24 }
 0x7e8   :  { %v672_v13 = vpack.c.bf16 %v671_v12, %v671_v12 }
 0x7ea   :  { %674 = vrot.lane.b32.xlu1 %v672_v13, %s2204_s21 }
 0x854   :  { %v563_v2 = vpop.permute.xlu0 %562 }
 0x855   :  { %1903 = vmatmul.mubr.msk.bf16.vlgmr.msra.gmra.mrb[12].mxu1 %vm219_vm2, %v563_v2 }
 0x856   :  { %1915 = vmatpush3.bf16.msra.mxu1 %v2300_v26  ;;  %1918 = vmatprep.mubr.msk.bf16.mxu1 %vm2201_vm1, %v2200_v0 }
 0x857   :  { %1916 = vmatprep.subr.bf16.mxu1 %v2200_v0 }
 0x85a   :  { %1917 = vmatpush3.bf16.msra.mxu1 %v2306_v27 }
 0x85b   :  { %1930 = vmatprep.subr.bf16.mxu1 %v2200_v0 }
 0x85c   :  { %v675_v14 = vpop.permute.xlu1 %674 }
 0x861   :  { %1919 = vmatmul.mubr.msk.bf16.vlgmr.msra.gmra.mrb[12].mxu1 %vm219_vm2, %v675_v14 }
 0x862   :  { %1931 = vmatpush3.bf16.msra.mxu1 %v2259_v1  ;;  %1934 = vmatprep.mubr.msk.bf16.mxu1 %vm2201_vm1, %v2200_v0 }
 0x863   :  { %1932 = vmatprep.subr.bf16.mxu1 %v2200_v0 }
 0x866   :  { %1933 = vmatpush3.bf16.msra.mxu1 %v2276_v5 }
 0x867   :  { %1946 = vmatprep.subr.bf16.mxu1 %v2200_v0 }
 0x869   :  { %1935 = vmatmul.mubr.msk.bf16.vlgmr.msra.gmra.mrb[16].mxu1 %vm219_vm2, %v675_v14 }
 0x86a   :  { %1947 = vmatpush3.bf16.msra.mxu1 %v2354_v9  ;;  %1950 = vmatprep.mubr.msk.bf16.mxu1 %vm2201_vm1, %v2200_v0 }
 0x86b   :  { %1948 = vmatprep.subr.bf16.mxu1 %v2200_v0 }
 0x86e   :  { %1949 = vmatpush3.bf16.msra.mxu1 %v2366_v11 }
 0x86f   :  { %1962 = vmatprep.subr.bf16.mxu1 %v2200_v0 }
 0x934   :  { %v713_v15 = vpop.f32.mrb[12].mxu1 }
 0x935   :  { %v2051_v16 = vadd.f32 %v2326_v33, %v713_v15  ;;  %v1920_v17 = vpop.f32.mrb[13].mxu1 }
 0x936   :  { %v716_v18 = vpop.f32.mrb[14].mxu1 }
 0x937   :  { %2128 = vtanh.f32 %v2051_v16  ;;  %v1921_v19 = vpop.f32.mrb[15].mxu1  ;;  %v719_v36 = vmul.f32 0.5, %v2051_v16 }
 0x93c   :  { %v824_v22 = vpop.f32.mrb[16].mxu1 }
 0x93d   :  { %v830_v29 = vadd.f32 %v824_v22, %v156_v20  ;;  %v1936_v30 = vpop.f32.mrb[17].mxu1 }
 0x93e   :  { %v827_v31 = vpop.f32.mrb[18].mxu1 }
 0x93f   :  { %2130 = vtanh.f32 %v830_v29  ;;  %v1937_v32 = vpop.f32.mrb[19].mxu1  ;;  %v831_v37 = vmul.f32 0.5, %v830_v29 }
 0x940   :  { %2132 = vtanh.f32 %v719_v36 }
 0x941   :  { %v2129_v34 = vpop.eup %2128  ;;  %2134 = vtanh.f32 %v831_v37 }
 0x942   :  { %726 = vrot.lane.b32.xlu0 %v2129_v34, %s2203_s20 }
 0x949   :  { %v2131_v35 = vpop.eup %2130 }
 0x94a   :  { %838 = vrot.lane.b32.xlu1 %v2131_v35, %s2203_s20  ;;  %v2133_v38 = vpop.eup %2132 }
 0x94b   :  { %v721_v39 = vmul.f32 0.5, %v2133_v38  ;;  %v2135_v21 = vpop.eup %2134 }
 0x94c   :  { %v833_v43 = vmul.f32 0.5, %v2135_v21 }
 0x94d   :  { %v722_v40 = vadd.f32 0.5, %v721_v39 }
 0x94e   :  { %v834_v44 = vadd.f32 0.5, %v833_v43 }
 0x94f   :  { %v724_v47 = vmul.f32 %v722_v40, %v2427_v59 }
 0x950   :  { %v836_v50 = vmul.f32 %v834_v44, %v2431_v63 }
 0x9b4   :  { %v727_v41 = vpop.permute.xlu0 %726 }
 0x9b5   :  { %v729_v42 = vmul.f32 %v727_v41, %v722_v40 }
 0x9b7   :  { %731 = vrot.lane.b32.xlu0 %v729_v42, %s2204_s21 }
 0x9bc   :  { %v839_v45 = vpop.permute.xlu1 %838 }
 0x9bd   :  { %v841_v46 = vmul.f32 %v839_v45, %v834_v44 }
 0x9bf   :  { %843 = vrot.lane.b32.xlu1 %v841_v46, %s2204_s21 }
 0xa29   :  { %v732_v48 = vpop.permute.xlu0 %731 }
 0xa2a   :  { %v2467_v49 = vadd.f32 %v732_v48, %v724_v47 }
 0xa2c   :  { %2136 = vtanh.f32 %v2467_v49 }
 0xa31   :  { %v844_v51 = vpop.permute.xlu1 %843 }
 0xa32   :  { %v2471_v52 = vadd.f32 %v844_v51, %v836_v50 }
 0xa34   :  { %2138 = vtanh.f32 %v2471_v52 }
 0xa36   :  { %v2137_v53 = vpop.eup %2136 }
 0xa37   :  { %737 = vrot.lane.b32.xlu0 %v2137_v53, %s2203_s20 }
 0xa3e   :  { %v2139_v54 = vpop.eup %2138 }
 0xa3f   :  { %849 = vrot.lane.b32.xlu1 %v2139_v54, %s2203_s20 }
 0xaa9   :  { %v738_v55 = vpop.permute.xlu0 %737 }
 0xaaa   :  { %v740_v56 = vmul.f32 %v738_v55, %v722_v40 }
 0xaac   :  { %v741_v57 = vpack.c.bf16 %v740_v56, %v740_v56 }
 0xaae   :  { %743 = vrot.lane.b32.xlu0 %v741_v57, %s2204_s21  ;;  %v166_v57 = vadd.f32 %v2391_v23, %v2289_v7 }
 0xab1   :  { %v850_v58 = vpop.permute.xlu1 %849 }
 0xab2   :  { %v852_v59 = vmul.f32 %v850_v58, %v834_v44 }
 0xab4   :  { %v853_v60 = vpack.c.bf16 %v852_v59, %v852_v59 }
 0xab6   :  { %855 = vrot.lane.b32.xlu1 %v853_v60, %s2204_s21 }
 0xb20   :  { %v744_v62 = vpop.permute.xlu0 %743 }
 0xb21   :  { %1927 = vmatmul.mubr.msk.bf16.vlgmr.msra.gmra.mrb[16].mxu0 %vm219_vm2, %v744_v62 }
 0xb22   :  { %1939 = vmatpush3.bf16.msra.mxu0 %v2300_v26  ;;  %1942 = vmatprep.mubr.msk.bf16.mxu0 %vm2201_vm1, %v2200_v0 }
 0xb23   :  { %1940 = vmatprep.subr.bf16.mxu0 %v2200_v0 }
 0xb26   :  { %1941 = vmatpush3.bf16.msra.mxu0 %v2306_v27 }
 0xb27   :  { %1954 = vmatprep.subr.bf16.mxu0 %v2200_v0 }
 0xb28   :  { %v856_v63 = vpop.permute.xlu1 %855 }
 0xb2d   :  { %1943 = vmatmul.mubr.msk.bf16.vlgmr.msra.gmra.mrb[16].mxu0 %vm219_vm2, %v856_v63 }
 0xb2e   :  { %1955 = vmatpush3.bf16.msra.mxu0 %v2259_v1  ;;  %1958 = vmatprep.mubr.msk.bf16.mxu0 %vm2201_vm1, %v2200_v0 }
 0xb2f   :  { %1956 = vmatprep.subr.bf16.mxu0 %v2200_v0 }
 0xb32   :  { %1957 = vmatpush3.bf16.msra.mxu0 %v2276_v5 }
 0xb33   :  { %1970 = vmatprep.subr.bf16.mxu0 %v2200_v0 }
 0xb35   :  { %1959 = vmatmul.mubr.msk.bf16.vlgmr.msra.gmra.mrb[20].mxu0 %vm219_vm2, %v856_v63 }
 0xb36   :  { %1971 = vmatpush3.bf16.msra.mxu0 %v2354_v9  ;;  %1974 = vmatprep.mubr.msk.bf16.mxu0 %vm2201_vm1, %v2200_v0 }
 0xb37   :  { %1972 = vmatprep.subr.bf16.mxu0 %v2200_v0 }
 0xb3a   :  { %1973 = vmatpush3.bf16.msra.mxu0 %v2366_v11 }
 0xb3b   :  { %1986 = vmatprep.subr.bf16.mxu0 %v2200_v0 }
 0xc00   :  { %v894_v3 = vpop.f32.mrb[16].mxu0 }
 0xc01   :  { %v2052_v4 = vadd.f32 %v2326_v33, %v894_v3  ;;  %v1944_v6 = vpop.f32.mrb[17].mxu0 }
 0xc02   :  { %v897_v61 = vpop.f32.mrb[18].mxu0 }
 0xc03   :  { %2140 = vtanh.f32 %v2052_v4  ;;  %v1945_v8 = vpop.f32.mrb[19].mxu0  ;;  %v900_v18 = vmul.f32 0.5, %v2052_v4 }
 0xc08   :  { %v1005_v12 = vpop.f32.mrb[20].mxu0 }
 0xc09   :  { %v1011_v13 = vadd.f32 %v1005_v12, %v161_v10  ;;  %v1960_v2 = vpop.f32.mrb[21].mxu0 }
 0xc0a   :  { %v1008_v14 = vpop.f32.mrb[22].mxu0 }
 0xc0b   :  { %2142 = vtanh.f32 %v1011_v13  ;;  %v1961_v15 = vpop.f32.mrb[23].mxu0  ;;  %v1012_v19 = vmul.f32 0.5, %v1011_v13 }
 0xc0c   :  { %2144 = vtanh.f32 %v900_v18 }
 0xc0d   :  { %v2141_v16 = vpop.eup %2140  ;;  %2146 = vtanh.f32 %v1012_v19 }
 0xc0e   :  { %907 = vrot.lane.b32.xlu0 %v2141_v16, %s2203_s20 }
 0xc15   :  { %v2143_v17 = vpop.eup %2142 }
 0xc16   :  { %1019 = vrot.lane.b32.xlu1 %v2143_v17, %s2203_s20  ;;  %v2145_v20 = vpop.eup %2144 }
 0xc17   :  { %v902_v22 = vmul.f32 0.5, %v2145_v20  ;;  %v2147_v24 = vpop.eup %2146 }
 0xc18   :  { %v1014_v32 = vmul.f32 0.5, %v2147_v24 }
 0xc19   :  { %v903_v29 = vadd.f32 0.5, %v902_v22 }
 0xc1a   :  { %v1015_v34 = vadd.f32 0.5, %v1014_v32 }
 0xc1b   :  { %v905_v37 = vmul.f32 %v903_v29, %v2467_v49 }
 0xc1c   :  { %v1017_v40 = vmul.f32 %v1015_v34, %v2471_v52 }
 0xc80   :  { %v908_v30 = vpop.permute.xlu0 %907 }
 0xc81   :  { %v910_v31 = vmul.f32 %v908_v30, %v903_v29 }
 0xc83   :  { %912 = vrot.lane.b32.xlu0 %v910_v31, %s2204_s21 }
 0xc88   :  { %v1020_v35 = vpop.permute.xlu1 %1019 }
 0xc89   :  { %v1022_v36 = vmul.f32 %v1020_v35, %v1015_v34 }
 0xc8b   :  { %1024 = vrot.lane.b32.xlu1 %v1022_v36, %s2204_s21 }
 0xcf5   :  { %v913_v38 = vpop.permute.xlu0 %912 }
 0xcf6   :  { %v2507_v39 = vadd.f32 %v913_v38, %v905_v37 }
 0xcf8   :  { %2148 = vtanh.f32 %v2507_v39 }
 0xcfd   :  { %v1025_v21 = vpop.permute.xlu1 %1024 }
 0xcfe   :  { %v2511_v41 = vadd.f32 %v1025_v21, %v1017_v40 }
 0xd00   :  { %2150 = vtanh.f32 %v2511_v41 }
 0xd02   :  { %v2149_v42 = vpop.eup %2148 }
 0xd03   :  { %918 = vrot.lane.b32.xlu0 %v2149_v42, %s2203_s20 }
 0xd0a   :  { %v2151_v43 = vpop.eup %2150 }
 0xd0b   :  { %1030 = vrot.lane.b32.xlu1 %v2151_v43, %s2203_s20  ;;  %v171_v43 = vadd.f32 %v2289_v7, %v2397_v28 }
 0xd75   :  { %v919_v44 = vpop.permute.xlu0 %918 }
 0xd76   :  { %v921_v45 = vmul.f32 %v919_v44, %v903_v29 }
 0xd78   :  { %v922_v46 = vpack.c.bf16 %v921_v45, %v921_v45 }
 0xd7a   :  { %924 = vrot.lane.b32.xlu0 %v922_v46, %s2204_s21 }
 0xd7d   :  { %v1031_v47 = vpop.permute.xlu1 %1030 }
 0xd7e   :  { %v1033_v48 = vmul.f32 %v1031_v47, %v1015_v34 }
 0xd80   :  { %v1034_v49 = vpack.c.bf16 %v1033_v48, %v1033_v48 }
 0xd82   :  { %1036 = vrot.lane.b32.xlu1 %v1034_v49, %s2204_s21 }
 0xdec   :  { %v925_v50 = vpop.permute.xlu0 %924 }
 0xded   :  { %1951 = vmatmul.mubr.msk.bf16.vlgmr.msra.gmra.mrb[20].mxu1 %vm219_vm2, %v925_v50 }
 0xdee   :  { %1963 = vmatpush3.bf16.msra.mxu1 %v2300_v26  ;;  %1966 = vmatprep.mubr.msk.bf16.mxu1 %vm2201_vm1, %v2200_v0 }
 0xdef   :  { %1964 = vmatprep.subr.bf16.mxu1 %v2200_v0 }
 0xdf2   :  { %1965 = vmatpush3.bf16.msra.mxu1 %v2306_v27 }
 0xdf3   :  { %1978 = vmatprep.subr.bf16.mxu1 %v2200_v0 }
 0xdf4   :  { %v1037_v51 = vpop.permute.xlu1 %1036 }
 0xdf9   :  { %1967 = vmatmul.mubr.msk.bf16.vlgmr.msra.gmra.mrb[20].mxu1 %vm219_vm2, %v1037_v51 }
 0xdfa   :  { %1979 = vmatpush3.bf16.msra.mxu1 %v2259_v1  ;;  %1982 = vmatprep.mubr.msk.bf16.mxu1 %vm2201_vm1, %v2200_v0 }
 0xdfb   :  { %1980 = vmatprep.subr.bf16.mxu1 %v2200_v0 }
 0xdfe   :  { %1981 = vmatpush3.bf16.msra.mxu1 %v2276_v5 }
 0xdff   :  { %1994 = vmatprep.subr.bf16.mxu1 %v2200_v0 }
 0xe01   :  { %1983 = vmatmul.mubr.msk.bf16.vlgmr.msra.gmra.mrb[24].mxu1 %vm219_vm2, %v1037_v51 }
 0xe02   :  { %1995 = vmatpush3.bf16.msra.mxu1 %v2354_v9  ;;  %1998 = vmatprep.mubr.msk.bf16.mxu1 %vm2201_vm1, %v2200_v0 }
 0xe03   :  { %1996 = vmatprep.subr.bf16.mxu1 %v2200_v0 }
 0xe06   :  { %1997 = vmatpush3.bf16.msra.mxu1 %v2366_v11 }
 0xe07   :  { %2010 = vmatprep.subr.bf16.mxu1 %v2200_v0 }
 0xecc   :  { %v1075_v52 = vpop.f32.mrb[20].mxu1 }
 0xecd   :  { %v2053_v53 = vadd.f32 %v2326_v33, %v1075_v52  ;;  %v1968_v54 = vpop.f32.mrb[21].mxu1 }
 0xece   :  { %v1078_v55 = vpop.f32.mrb[22].mxu1 }
 0xecf   :  { %2152 = vtanh.f32 %v2053_v53  ;;  %v1969_v56 = vpop.f32.mrb[23].mxu1  ;;  %v1081_v6 = vmul.f32 0.5, %v2053_v53 }
 0xed4   :  { %v1186_v58 = vpop.f32.mrb[24].mxu1 }
 0xed5   :  { %v1192_v59 = vadd.f32 %v1186_v58, %v166_v57  ;;  %v1984_v60 = vpop.f32.mrb[25].mxu1 }
 0xed6   :  { %v1189_v62 = vpop.f32.mrb[26].mxu1 }
 0xed7   :  { %2154 = vtanh.f32 %v1192_v59  ;;  %v1985_v63 = vpop.f32.mrb[27].mxu1  ;;  %v1193_v61 = vmul.f32 0.5, %v1192_v59 }
 0xed8   :  { %2156 = vtanh.f32 %v1081_v6 }
 0xed9   :  { %v2153_v3 = vpop.eup %2152  ;;  %2158 = vtanh.f32 %v1193_v61 }
 0xeda   :  { %1088 = vrot.lane.b32.xlu0 %v2153_v3, %s2203_s20 }
 0xee1   :  { %v2155_v4 = vpop.eup %2154 }
 0xee2   :  { %1200 = vrot.lane.b32.xlu1 %v2155_v4, %s2203_s20  ;;  %v2157_v8 = vpop.eup %2156 }
 0xee3   :  { %v1083_v10 = vmul.f32 0.5, %v2157_v8  ;;  %v2159_v23 = vpop.eup %2158 }
 0xee4   :  { %v1195_v14 = vmul.f32 0.5, %v2159_v23 }
 0xee5   :  { %v1084_v12 = vadd.f32 0.5, %v1083_v10 }
 0xee6   :  { %v1196_v15 = vadd.f32 0.5, %v1195_v14 }
 0xee7   :  { %v1086_v18 = vmul.f32 %v1084_v12, %v2507_v39 }
 0xee8   :  { %v1198_v22 = vmul.f32 %v1196_v15, %v2511_v41 }
 0xf4c   :  { %v1089_v13 = vpop.permute.xlu0 %1088 }
 0xf4d   :  { %v1091_v2 = vmul.f32 %v1089_v13, %v1084_v12 }
 0xf4f   :  { %1093 = vrot.lane.b32.xlu0 %v1091_v2, %s2204_s21 }
 0xf54   :  { %v1201_v16 = vpop.permute.xlu1 %1200 }
 0xf55   :  { %v1203_v17 = vmul.f32 %v1201_v16, %v1196_v15  ;;  %v2194_v16 = vld [vmem:[%s2666_s3] sm:$0xff]  }
 0xf57   :  { %1205 = vrot.lane.b32.xlu1 %v1203_v17, %s2204_s21 }
 0xfc1   :  { %v1094_v19 = vpop.permute.xlu0 %1093 }
 0xfc2   :  { %v2547_v20 = vadd.f32 %v1094_v19, %v1086_v18 }
 0xfc4   :  { %2160 = vtanh.f32 %v2547_v20 }
 0xfc9   :  { %v1206_v29 = vpop.permute.xlu1 %1205 }
 0xfca   :  { %v2551_v24 = vadd.f32 %v1206_v29, %v1198_v22  ;;  %v2196_v22 = vld [vmem:[%s2669_s2] ss:$0 sm:$0xff] }
 0xfcb   :  { %v176_v29 = vadd.f32 %v2196_v22, %v2395_v25 }
 0xfcc   :  { %2162 = vtanh.f32 %v2551_v24 }
 0xfce   :  { %v2161_v30 = vpop.eup %2160 }
 0xfcf   :  { %1099 = vrot.lane.b32.xlu0 %v2161_v30, %s2203_s20 }
 0xfd6   :  { %v2163_v31 = vpop.eup %2162 }
 0xfd7   :  { %1211 = vrot.lane.b32.xlu1 %v2163_v31, %s2203_s20 }
0x1041   :  { %v1100_v32 = vpop.permute.xlu0 %1099 }
0x1042   :  { %v1102_v34 = vmul.f32 %v1100_v32, %v1084_v12 }
0x1044   :  { %v1103_v35 = vpack.c.bf16 %v1102_v34, %v1102_v34 }
0x1046   :  { %1105 = vrot.lane.b32.xlu0 %v1103_v35, %s2204_s21 }
0x1049   :  { %v1212_v36 = vpop.permute.xlu1 %1211 }
0x104a   :  { %v1214_v37 = vmul.f32 %v1212_v36, %v1196_v15 }
0x104c   :  { %v1215_v38 = vpack.c.bf16 %v1214_v37, %v1214_v37 }
0x104e   :  { %1217 = vrot.lane.b32.xlu1 %v1215_v38, %s2204_s21 }
0x10b8   :  { %v1106_v39 = vpop.permute.xlu0 %1105 }
0x10b9   :  { %1975 = vmatmul.mubr.msk.bf16.vlgmr.msra.gmra.mrb[24].mxu0 %vm219_vm2, %v1106_v39 }
0x10ba   :  { %1987 = vmatpush3.bf16.msra.mxu0 %v2300_v26  ;;  %1990 = vmatprep.mubr.msk.bf16.mxu0 %vm2201_vm1, %v2200_v0 }
0x10bb   :  { %1988 = vmatprep.subr.bf16.mxu0 %v2200_v0 }
0x10be   :  { %1989 = vmatpush3.bf16.msra.mxu0 %v2306_v27 }
0x10bf   :  { %2002 = vmatprep.subr.bf16.mxu0 %v2200_v0 }
0x10c0   :  { %v1218_v40 = vpop.permute.xlu1 %1217 }
0x10c5   :  { %1991 = vmatmul.mubr.msk.bf16.vlgmr.msra.gmra.mrb[24].mxu0 %vm219_vm2, %v1218_v40 }
0x10c6   :  { %2003 = vmatpush3.bf16.msra.mxu0 %v2259_v1  ;;  %2006 = vmatprep.mubr.msk.bf16.mxu0 %vm2201_vm1, %v2200_v0 }
0x10c7   :  { %2004 = vmatprep.subr.bf16.mxu0 %v2200_v0 }
0x10ca   :  { %2005 = vmatpush3.bf16.msra.mxu0 %v2276_v5 }
0x10cb   :  { %2018 = vmatprep.subr.bf16.mxu0 %v2200_v0 }
0x10cd   :  { %2007 = vmatmul.mubr.msk.bf16.vlgmr.msra.gmra.mrb[28].mxu0 %vm219_vm2, %v1218_v40 }
0x10ce   :  { %2019 = vmatpush3.bf16.msra.mxu0 %v2354_v9  ;;  %2022 = vmatprep.mubr.msk.bf16.mxu0 %vm2201_vm1, %v2200_v0 }
0x10cf   :  { %2020 = vmatprep.subr.bf16.mxu0 %v2200_v0 }
0x10d2   :  { %2021 = vmatpush3.bf16.msra.mxu0 %v2366_v11 }
0x10d3   :  { %2034 = vmatprep.subr.bf16.mxu0 %v2200_v0 }
0x1198   :  { %v1256_v1 = vpop.f32.mrb[24].mxu0 }
0x1199   :  { %v2054_v21 = vadd.f32 %v2326_v33, %v1256_v1  ;;  %v1992_v41 = vpop.f32.mrb[25].mxu0 }
0x119a   :  { %v1259_v5 = vpop.f32.mrb[26].mxu0 }
0x119b   :  { %2164 = vtanh.f32 %v2054_v21  ;;  %v1993_v42 = vpop.f32.mrb[27].mxu0  ;;  %v1262_v49 = vmul.f32 0.5, %v2054_v21 }
0x11a0   :  { %v1367_v9 = vpop.f32.mrb[28].mxu0 }
0x11a1   :  { %v1373_v44 = vadd.f32 %v1367_v9, %v171_v43  ;;  %v2008_v45 = vpop.f32.mrb[29].mxu0 }
0x11a2   :  { %v1370_v46 = vpop.f32.mrb[30].mxu0 }
0x11a3   :  { %2166 = vtanh.f32 %v1373_v44  ;;  %v2009_v47 = vpop.f32.mrb[31].mxu0  ;;  %v1374_v50 = vmul.f32 0.5, %v1373_v44 }
0x11a4   :  { %2168 = vtanh.f32 %v1262_v49 }
0x11a5   :  { %v2165_v48 = vpop.eup %2164  ;;  %2170 = vtanh.f32 %v1374_v50 }
0x11a6   :  { %1269 = vrot.lane.b32.xlu0 %v2165_v48, %s2203_s20 }
0x11ad   :  { %v2167_v11 = vpop.eup %2166 }
0x11ae   :  { %1381 = vrot.lane.b32.xlu1 %v2167_v11, %s2203_s20  ;;  %v2169_v51 = vpop.eup %2168 }
0x11af   :  { %v1264_v52 = vmul.f32 0.5, %v2169_v51  ;;  %v2171_v7 = vpop.eup %2170 }
0x11b0   :  { %v1376_v55 = vmul.f32 0.5, %v2171_v7 }
0x11b1   :  { %v1265_v53 = vadd.f32 0.5, %v1264_v52 }
0x11b2   :  { %v1377_v56 = vadd.f32 0.5, %v1376_v55  ;;  %v2197_v55 = vld [vmem:[%s2670_s4] sm:$0xff]  }
0x11b3   :  { %v1267_v59 = vmul.f32 %v1265_v53, %v2547_v20 }
0x11b4   :  { %v1379_v63 = vmul.f32 %v1377_v56, %v2551_v24 }
0x1218   :  { %v1270_v28 = vpop.permute.xlu0 %1269 }
0x1219   :  { %v1272_v54 = vmul.f32 %v1270_v28, %v1265_v53 }
0x121b   :  { %1274 = vrot.lane.b32.xlu0 %v1272_v54, %s2204_s21 }
0x1220   :  { %v1382_v57 = vpop.permute.xlu1 %1381 }
0x1221   :  { %v1384_v58 = vmul.f32 %v1382_v57, %v1377_v56 }
0x1223   :  { %1386 = vrot.lane.b32.xlu1 %v1384_v58, %s2204_s21 }
0x128d   :  { %v1275_v60 = vpop.permute.xlu0 %1274 }
0x128e   :  { %v2587_v62 = vadd.f32 %v1275_v60, %v1267_v59  ;;  %v2199_v59 = vld [vmem:[%s2671_s6] ss:$0 sm:$0xff] }
0x1290   :  { %2172 = vtanh.f32 %v2587_v62 }
0x1295   :  { %v1387_v3 = vpop.permute.xlu1 %1386 }
0x1296   :  { %v2591_v4 = vadd.f32 %v1387_v3, %v1379_v63 }
0x1298   :  { %2174 = vtanh.f32 %v2591_v4 }
0x129a   :  { %v2173_v6 = vpop.eup %2172 }
0x129b   :  { %1280 = vrot.lane.b32.xlu0 %v2173_v6, %s2203_s20 }
0x12a2   :  { %v2175_v61 = vpop.eup %2174 }
0x12a3   :  { %1392 = vrot.lane.b32.xlu1 %v2175_v61, %s2203_s20 }
0x130d   :  { %v1281_v8 = vpop.permute.xlu0 %1280 }
0x130e   :  { %v1283_v10 = vmul.f32 %v1281_v8, %v1265_v53 }
0x1310   :  { %v1284_v12 = vpack.c.bf16 %v1283_v10, %v1283_v10 }
0x1312   :  { %1286 = vrot.lane.b32.xlu0 %v1284_v12, %s2204_s21 }
0x1315   :  { %v1393_v23 = vpop.permute.xlu1 %1392 }
0x1316   :  { %v1395_v13 = vmul.f32 %v1393_v23, %v1377_v56  ;;  %v2198_v56 = vld [vmem:[%s2670_s4 + $0x8] sm:$0xff]  }
0x1318   :  { %v1396_v2 = vpack.c.bf16 %v1395_v13, %v1395_v13 }
0x131a   :  { %1398 = vrot.lane.b32.xlu1 %v1396_v2, %s2204_s21 }
0x1384   :  { %v1287_v14 = vpop.permute.xlu0 %1286 }
0x1385   :  { %1999 = vmatmul.mubr.msk.bf16.vlgmr.msra.gmra.mrb[28].mxu1 %vm219_vm2, %v1287_v14 }
0x1386   :  { %2011 = vmatpush3.bf16.msra.mxu1 %v2300_v26  ;;  %2014 = vmatprep.mubr.msk.bf16.mxu1 %vm2201_vm1, %v2200_v0  ;;  %v2195_v26 = vld [vmem:[%s2666_s3 + $0x8] sm:$0xff]  }
0x1387   :  { %2012 = vmatprep.subr.bf16.mxu1 %v2200_v0 }
0x138a   :  { %2013 = vmatpush3.bf16.msra.mxu1 %v2306_v27 }
0x138b   :  { %2026 = vmatprep.subr.bf16.mxu1 %v2200_v0 }
0x138c   :  { %v1399_v15 = vpop.permute.xlu1 %1398 }
0x1391   :  { %2015 = vmatmul.mubr.msk.bf16.vlgmr.msra.gmra.mrb[28].mxu1 %vm219_vm2, %v1399_v15 }
0x1392   :  { %2027 = vmatpush3.bf16.msra.mxu1 %v2194_v16  ;;  %2030 = vmatprep.mubr.msk.bf16.mxu1 %vm2201_vm1, %v2200_v0  ;;  %v2097_v16 = vld [vmem:[%s2673_s7 + $0x8] sm:$0xff]  }
0x1393   :  { %2028 = vmatprep.subr.bf16.mxu1 %v2200_v0 }
0x1396   :  { %2029 = vmatpush3.bf16.msra.mxu1 %v2195_v26 }
0x1397   :  { %2042 = vmatprep.subr.bf16.mxu1 %v2200_v0 }
0x1399   :  { %2031 = vmatmul.mubr.msk.bf16.vlgmr.msra.gmra.mrb[32].mxu1 %vm219_vm2, %v1399_v15  ;;  %v2096_v15 = vld [vmem:[%s2673_s7] sm:$0xff]  }
0x139a   :  { %2046 = vmatprep.mubr.msk.bf16.mxu1 %vm2201_vm1, %v2200_v0  ;;  %2043 = vmatpush3.bf16.msra.mxu1 %v2096_v15 }
0x139b   :  { %2044 = vmatprep.subr.bf16.mxu1 %v2200_v0 }
0x139e   :  { %2045 = vmatpush3.bf16.msra.mxu1 %v2097_v16 }
0x1464   :  { %v1437_v27 = vpop.f32.mrb[28].mxu1 }
0x1465   :  { %v2055_v17 = vadd.f32 %v2326_v33, %v1437_v27  ;;  %v2016_v18 = vpop.f32.mrb[29].mxu1 }
0x1466   :  { %v1440_v19 = vpop.f32.mrb[30].mxu1 }
0x1467   :  { %2176 = vtanh.f32 %v2055_v17  ;;  %v2017_v20 = vpop.f32.mrb[31].mxu1  ;;  %v1443_v36 = vmul.f32 0.5, %v2055_v17 }
0x1468   :  { %v1759_v20 = vld [vmem:[%s2674_s8] ss:$0 sm:$0xff] }
0x146c   :  { %v1548_v24 = vpop.f32.mrb[32].mxu1 }
0x146d   :  { %v1554_v30 = vadd.f32 %v1548_v24, %v176_v29  ;;  %v2032_v31 = vpop.f32.mrb[33].mxu1 }
0x146e   :  { %v1551_v32 = vpop.f32.mrb[34].mxu1 }
0x146f   :  { %2178 = vtanh.f32 %v1554_v30  ;;  %v2033_v34 = vpop.f32.mrb[35].mxu1  ;;  %v1555_v37 = vmul.f32 0.5, %v1554_v30 }
0x1470   :  { %2180 = vtanh.f32 %v1443_v36 }
0x1471   :  { %v2177_v35 = vpop.eup %2176  ;;  %2182 = vtanh.f32 %v1555_v37 }
0x1472   :  { %1450 = vrot.lane.b32.xlu0 %v2177_v35, %s2203_s20 }
0x1479   :  { %v2179_v33 = vpop.eup %2178 }
0x147a   :  { %1562 = vrot.lane.b32.xlu1 %v2179_v33, %s2203_s20  ;;  %v2181_v38 = vpop.eup %2180 }
0x147b   :  { %v1445_v39 = vmul.f32 0.5, %v2181_v38  ;;  %v2183_v25 = vpop.eup %2182 }
0x147c   :  { %v1557_v41 = vmul.f32 0.5, %v2183_v25 }
0x147d   :  { %v1446_v40 = vadd.f32 0.5, %v1445_v39 }
0x147e   :  { %v1558_v5 = vadd.f32 0.5, %v1557_v41 }
0x147f   :  { %v1448_v9 = vmul.f32 %v1446_v40, %v2587_v62 }
0x1480   :  { %v1560_v46 = vmul.f32 %v1558_v5, %v2591_v4 }
0x14e4   :  { %v1451_v1 = vpop.permute.xlu0 %1450 }
0x14e5   :  { %v1453_v21 = vmul.f32 %v1451_v1, %v1446_v40 }
0x14e7   :  { %1455 = vrot.lane.b32.xlu0 %v1453_v21, %s2204_s21 }
0x14ec   :  { %v1563_v42 = vpop.permute.xlu1 %1562 }
0x14ed   :  { %v1565_v43 = vmul.f32 %v1563_v42, %v1558_v5 }
0x14ef   :  { %1567 = vrot.lane.b32.xlu1 %v1565_v43, %s2204_s21 }
0x1559   :  { %v1456_v44 = vpop.permute.xlu0 %1455 }
0x155a   :  { %v1458_v45 = vadd.f32 %v1456_v44, %v1448_v9 }
0x155c   :  { %2184 = vtanh.f32 %v1458_v45 }
0x1561   :  { %v1568_v47 = vpop.permute.xlu1 %1567 }
0x1562   :  { %v1570_v48 = vadd.f32 %v1568_v47, %v1560_v46 }
0x1564   :  { %2186 = vtanh.f32 %v1570_v48 }
0x1566   :  { %v2185_v11 = vpop.eup %2184 }
0x1567   :  { %1461 = vrot.lane.b32.xlu0 %v2185_v11, %s2203_s20 }
0x156e   :  { %v2187_v49 = vpop.eup %2186 }
0x156f   :  { %1573 = vrot.lane.b32.xlu1 %v2187_v49, %s2203_s20 }
0x15d9   :  { %v1462_v50 = vpop.permute.xlu0 %1461 }
0x15da   :  { %v1464_v51 = vmul.f32 %v1462_v50, %v1446_v40 }
0x15dc   :  { %v1465_v52 = vpack.c.bf16 %v1464_v51, %v1464_v51 }
0x15de   :  { %1467 = vrot.lane.b32.xlu0 %v1465_v52, %s2204_s21 }
0x15e1   :  { %v1574_v53 = vpop.permute.xlu1 %1573 }
0x15e2   :  { %v1576_v7 = vmul.f32 %v1574_v53, %v1558_v5 }
0x15e4   :  { %v1577_v28 = vpack.c.bf16 %v1576_v7, %v1576_v7 }
0x15e6   :  { %1579 = vrot.lane.b32.xlu1 %v1577_v28, %s2204_s21 }
0x1650   :  { %v1468_v54 = vpop.permute.xlu0 %1467 }
0x1651   :  { %2023 = vmatmul.mubr.msk.bf16.vlgmr.msra.gmra.mrb[32].mxu0 %vm219_vm2, %v1468_v54 }
0x1652   :  { %2035 = vmatpush3.bf16.msra.mxu0 %v2197_v55  ;;  %2038 = vmatprep.mubr.msk.bf16.mxu0 %vm2201_vm1, %v2200_v0 }
0x1653   :  { %2036 = vmatprep.subr.bf16.mxu0 %v2200_v0 }
0x1656   :  { %2037 = vmatpush3.bf16.msra.mxu0 %v2198_v56 }
0x1658   :  { %v1580_v57 = vpop.permute.xlu1 %1579 }
0x165d   :  { %2039 = vmatmul.mubr.msk.bf16.vlgmr.msra.gmra.mrb[32].mxu0 %vm219_vm2, %v1580_v57 }
0x1730   :  { %v1618_v58 = vpop.f32.mrb[32].mxu0 }
0x1731   :  { %v2056_v60 = vadd.f32 %v2199_v59, %v1618_v58  ;;  %v2040_v62 = vpop.f32.mrb[33].mxu0 }
0x1732   :  { %v1621_v63 = vpop.f32.mrb[34].mxu0 }
0x1733   :  { %2188 = vtanh.f32 %v2056_v60  ;;  %v2041_v3 = vpop.f32.mrb[35].mxu0  ;;  %v1624_v6 = vmul.f32 0.5, %v2056_v60 }
0x1735   :  { %2190 = vtanh.f32 %v1624_v6 }
0x173d   :  { %v2189_v4 = vpop.eup %2188 }
0x173e   :  { %1631 = vrot.lane.b32.xlu0 %v2189_v4, %s2203_s20 }
0x173f   :  { %v2191_v61 = vpop.eup %2190 }
0x1740   :  { %v1626_v8 = vmul.f32 0.5, %v2191_v61 }
0x1742   :  { %v1627_v10 = vadd.f32 0.5, %v1626_v8 }
0x1744   :  { %v1629_v13 = vmul.f32 %v1627_v10, %v1458_v45 }
0x17b0   :  { %v1632_v12 = vpop.permute.xlu0 %1631 }
0x17b1   :  { %v1634_v23 = vmul.f32 %v1632_v12, %v1627_v10 }
0x17b3   :  { %1636 = vrot.lane.b32.xlu1 %v1634_v23, %s2204_s21 }
0x1825   :  { %v1637_v2 = vpop.permute.xlu1 %1636 }
0x1826   :  { %v1639_v14 = vadd.f32 %v1637_v2, %v1629_v13 }
0x1828   :  { %2192 = vtanh.f32 %v1639_v14 }
0x1832   :  { %v2193_v26 = vpop.eup %2192 }
0x1833   :  { %1642 = vrot.lane.b32.xlu0 %v2193_v26, %s2203_s20 }
0x18a5   :  { %v1643_v27 = vpop.permute.xlu0 %1642 }
0x18a6   :  { %v1645_v17 = vmul.f32 %v1643_v27, %v1627_v10 }
0x18a8   :  { %v1646_v18 = vpack.c.bf16 %v1645_v17, %v1645_v17 }
0x18aa   :  { %1659 = vrot.lane.b32.xlu1 %v1646_v18, %s2204_s21 }
0x191c   :  { %v1660_v19 = vpop.permute.xlu1 %1659 }
0x191d   :  { %2047 = vmatmul.mubr.msk.bf16.vlgmr.msra.gmra.mrb[36].mxu1 %vm219_vm2, %v1660_v19 }
0x19f0   :  { %v1710_v22 = vpop.f32.mrb[36].mxu1 }
0x19f1   :  { %v1711_v29 = vadd.f32 %v1759_v20, %v1710_v22  ;;  %v2048_v24 = vpop.f32.mrb[37].mxu1 }
0x19f2   :  { %v1713_v0 = vpop.f32.mrb[38].mxu1 }
0x19f3   :  { %1716 = vst [vmem:[%s2675_s9] sm:$0xff] %v1711_v29  ;;  %v2049_v30 = vpop.f32.mrb[39].mxu1 }

</bundles_post_ra>
